<compile_context>
chip_gen: v6e
topology: v6e:2x2x1
jax: 0.10.0
libtpu: 0.0.40
codegen_flags: <defaults>
</compile_context>

<pallas_src>
import functools

import numpy as np
import jax
import jax.numpy as jnp
from jax.experimental import pallas as pl
from jax.experimental.pallas import tpu as pltpu

# Plain Python floats: become jaxpr literals, nothing is captured by the kernel.
NEG_INF = -1e30
NEG_SLOPE = 0.2


def _gat_layer(h_in_bf16, adj_f32, w_aug, bias, c_pad):
    """One dense GATConv on a single node block.

    h_in_bf16: (NB, Cin_pad) bf16          node features (MXU operand)
    adj_f32:   (NB, NB) f32                >0 where edge j->i (incl. self loops)
    w_aug:     (Cin_pad, c_pad + 2) bf16   [W_pad | W@att_src^T | W@att_dst^T]
    bias:      (1, c_pad) f32
    returns:   (NB, c_pad) f32
    """
    # Single MXU matmul produces h and both attention scores (bf16 in, f32 acc).
    h_aug = jnp.dot(h_in_bf16, w_aug, preferred_element_type=jnp.float32)
    h = h_aug[:, :c_pad]                        # lane-aligned slab (c_pad % 128 == 0)
    a_src_row = h_aug[:, c_pad:c_pad + 1].T     # (1, NB): one tiny XLU transpose per block
    a_dst_col = h_aug[:, c_pad + 1:c_pad + 2]   # (NB, 1)

    e = a_dst_col + a_src_row                   # (NB, NB): e[i, j], f32
    e = jnp.where(e > 0, e, NEG_SLOPE * e)      # leaky_relu (f32 on VPU; v5e has no bf16 VPU)
    e = jnp.where(adj_f32 > 0, e, NEG_INF)      # edge mask expanded in-vreg (no f32 mask from HBM)
    e = e - jnp.max(e, axis=-1, keepdims=True)  # stable softmax (safe: every node has self loop)
    p = jnp.exp(e)
    p = p * pl.reciprocal(jnp.sum(p, axis=-1, keepdims=True), approx=True)  # EUP slot

    # Aggregation on the MXU in bf16, accumulate f32.
    return jnp.dot(p.astype(jnp.bfloat16), h.astype(jnp.bfloat16),
                   preferred_element_type=jnp.float32) + bias


def gat_kernel(x_ref, adj_ref, pool_ref,
               w_aug1_ref, b1_ref, w_aug2_ref, b2_ref,
               out_ref, *, num_classes, h_pad, c_pad):
    # int8 adjacency -> f32 once per block (quant-style widen; used by both layers).
    adj = adj_ref[0].astype(jnp.float32)                           # (NB, NB)

    # conv1 + relu
    h1 = _gat_layer(x_ref[...].astype(jnp.bfloat16), adj,
                    w_aug1_ref[...], b1_ref[...], h_pad)
    h1 = jnp.maximum(h1, 0.0)

    # conv2
    h2 = _gat_layer(h1.astype(jnp.bfloat16), adj,
                    w_aug2_ref[...], b2_ref[...], c_pad)

    # global_mean_pool for this block's graphs: (GPB, NB) @ (NB, c_pad), bf16 MXU operands.
    pooled = jnp.dot(pool_ref[...], h2.astype(jnp.bfloat16),
                     preferred_element_type=jnp.float32)

    # Exact log_softmax over the real classes only; padded class columns are masked out.
    cls = jax.lax.broadcasted_iota(jnp.int32, (1, c_pad), 1)
    pooled = jnp.where(cls < num_classes, pooled, NEG_INF)
    m = jnp.max(pooled, axis=-1, keepdims=True)
    lse = jnp.log(jnp.sum(jnp.exp(pooled - m), axis=-1, keepdims=True)) + m
    out_ref[...] = pooled - lse                                    # lane-dense (GPB, 128) store


def _pad2(a, rows, cols):
    """Zero-pad a 2-D array to (rows, cols)."""
    return jnp.zeros((rows, cols), a.dtype).at[:a.shape[0], :a.shape[1]].set(a)


def _build_aug_weight(w, att_src, att_dst, cin_pad, cout_pad):
    """(Cin, Cout) -> (cin_pad, cout_pad + 2) bf16: [W_pad | W@att_src^T | W@att_dst^T]."""
    w_pad = _pad2(w, cin_pad, cout_pad)
    src_col = w_pad @ _pad2(att_src.reshape(-1, 1), cout_pad, 1)   # (cin_pad, 1)
    dst_col = w_pad @ _pad2(att_dst.reshape(-1, 1), cout_pad, 1)   # (cin_pad, 1)
    return jnp.concatenate([w_pad, src_col, dst_col], axis=1).astype(jnp.bfloat16)


def gat_forward(x_pad, adj_blocks, pool_blocks, w_aug1, b1, w_aug2, b2, *,
                nb, gpb, num_classes):
    """x_pad: (num_blocks*nb, cin_pad) f32, adj_blocks: (num_blocks, nb, nb) int8,
    pool_blocks: (num_blocks*gpb, nb) bf16. Returns (num_blocks*gpb, c_pad) f32 log-probs."""
    num_blocks = adj_blocks.shape[0]
    cin_pad = x_pad.shape[1]
    h_pad = w_aug1.shape[1] - 2
    c_pad = w_aug2.shape[1] - 2
    kernel = functools.partial(gat_kernel, num_classes=num_classes,
                               h_pad=h_pad, c_pad=c_pad)
    # VMEM sizing note: the dense (nb, nb) attention tile caps nb per generation
    # (~2048 on v7x's 64 MiB, ~4096 on v5e/v6e's 128 MiB); nb=128 here is far under the
    # default scoped limit, so vmem_limit_bytes is left at its default.  For large hidden
    # sizes on v6e/v7x, pad channel tiles toward 256 (2x256^2 MXU); 128 suffices on v5e.
    # TODO(synk): for ragged real-world batches, pack variable-size graphs per block
    # wrapper-side and drive per-block graph counts / offsets via scalar prefetch.
    return pl.pallas_call(
        kernel,
        out_shape=jax.ShapeDtypeStruct((num_blocks * gpb, c_pad), jnp.float32),
        grid_spec=pltpu.PrefetchScalarGridSpec(
            num_scalar_prefetch=0,
            grid=(num_blocks,),
            in_specs=[
                pl.BlockSpec((nb, cin_pad), lambda b: (b, 0)),       # node features
                pl.BlockSpec((1, nb, nb), lambda b: (b, 0, 0)),      # int8 adjacency block
                pl.BlockSpec((gpb, nb), lambda b: (b, 0)),           # mean-pool rows (bf16)
                pl.BlockSpec(w_aug1.shape, lambda b: (0, 0)),        # shared weights
                pl.BlockSpec(b1.shape, lambda b: (0, 0)),
                pl.BlockSpec(w_aug2.shape, lambda b: (0, 0)),
                pl.BlockSpec(b2.shape, lambda b: (0, 0)),
            ],
            out_specs=pl.BlockSpec((gpb, c_pad), lambda b: (b, 0)),  # lane-dense output
        ),
        compiler_params=pltpu.CompilerParams(
            dimension_semantics=("parallel",)),   # shards blocks across v7x's 2 TCs
    )(x_pad, adj_blocks, pool_blocks, w_aug1, b1, w_aug2, b2)


def _reference_forward(x, adj, pool, params):
    """Pure-JAX f32 reference of the same forward pass (for correctness check)."""
    def layer(h_in, w, att_src, att_dst, bias):
        h = h_in @ w
        a_src = h @ att_src.reshape(-1, 1)
        a_dst = h @ att_dst.reshape(-1, 1)
        e = a_dst + a_src.T
        e = jnp.where(e > 0, e, NEG_SLOPE * e)
        e = jnp.where(adj > 0, e, NEG_INF)
        p = jax.nn.softmax(e, axis=-1)
        return p @ h + bias

    h1 = jnp.maximum(layer(x, params["w1"], params["att_src1"],
                           params["att_dst1"], params["b1"]), 0.0)
    h2 = layer(h1, params["w2"], params["att_src2"], params["att_dst2"], params["b2"])
    pooled = pool @ h2
    return jax.nn.log_softmax(pooled, axis=-1)


def glorot(key, shape):
    fan_in, fan_out = shape[0], shape[-1]
    limit = np.sqrt(6.0 / (fan_in + fan_out))
    return jax.random.uniform(key, shape, jnp.float32, -limit, limit)


if __name__ == "__main__":
    # 16 graphs x 16 nodes, packed 8 whole graphs per 128-node block -> grid of 2 blocks.
    NODES_PER_GRAPH = 16
    GPB = 8                              # graphs per node block
    NB = GPB * NODES_PER_GRAPH           # 128 nodes per block (lane-dense attention tile)
    NUM_BLOCKS = 2
    G = NUM_BLOCKS * GPB                 # 16 graphs
    N = NUM_BLOCKS * NB                  # 256 nodes
    C_IN, HIDDEN, C_OUT = 8, 32, 4
    CIN_PAD, H_PAD, C_PAD = 128, 128, 128  # lane-dense channel tiles

    # --- graph structure (glue, plain numpy) ---
    edges = []
    for g in range(G):
        base = g * NODES_PER_GRAPH
        for i in range(NODES_PER_GRAPH - 1):             # bidirectional chain
            edges.append((base + i, base + i + 1))
            edges.append((base + i + 1, base + i))
        edges.append((base, base + 4))                    # one shortcut edge
        edges.append((base + 4, base))
    edge_index = np.array(edges, np.int32).T              # (2, E): [src; dst]

    adj_full = np.zeros((N, N), np.float32)
    adj_full[edge_index[1], edge_index[0]] = 1.0           # message src -> dst
    np.fill_diagonal(adj_full, 1.0)                        # add_self_loops

    # Per-block int8 adjacency (exact: whole graphs per block => cross-block entries are 0).
    adj_blocks = np.zeros((NUM_BLOCKS, NB, NB), np.int8)
    for b in range(NUM_BLOCKS):
        adj_blocks[b] = adj_full[b * NB:(b + 1) * NB, b * NB:(b + 1) * NB].astype(np.int8)

    batch = np.repeat(np.arange(G, dtype=np.int32), NODES_PER_GRAPH)
    pool_full = np.zeros((G, N), np.float32)
    for g in range(G):
        m = batch == g
        pool_full[g, m] = 1.0 / m.sum()                    # global_mean_pool matrix
    pool_blocks = np.zeros((G, NB), np.float32)
    for b in range(NUM_BLOCKS):
        pool_blocks[b * GPB:(b + 1) * GPB] = pool_full[b * GPB:(b + 1) * GPB,
                                                       b * NB:(b + 1) * NB]

    # --- deterministic parameter init (synthetic, not a checkpoint) ---
    key = jax.random.PRNGKey(0)
    k_x, k_w1, k_s1, k_d1, k_w2, k_s2, k_d2 = jax.random.split(key, 7)
    params = {
        "w1": glorot(k_w1, (C_IN, HIDDEN)),
        "att_src1": glorot(k_s1, (1, HIDDEN)),
        "att_dst1": glorot(k_d1, (1, HIDDEN)),
        "b1": jnp.zeros((1, HIDDEN), jnp.float32),
        "w2": glorot(k_w2, (HIDDEN, C_OUT)),
        "att_src2": glorot(k_s2, (1, C_OUT)),
        "att_dst2": glorot(k_d2, (1, C_OUT)),
        "b2": jnp.zeros((1, C_OUT), jnp.float32),
    }
    x = jax.random.normal(k_x, (N, C_IN), jnp.float32)

    # --- wrapper-side packing: pad channels to lane-dense tiles, fold attention columns ---
    x_pad = _pad2(x, N, CIN_PAD)
    w_aug1 = _build_aug_weight(params["w1"], params["att_src1"], params["att_dst1"],
                               CIN_PAD, H_PAD)
    w_aug2 = _build_aug_weight(params["w2"], params["att_src2"], params["att_dst2"],
                               H_PAD, C_PAD)
    b1 = _pad2(params["b1"], 1, H_PAD)
    b2 = _pad2(params["b2"], 1, C_PAD)

    out_pad = gat_forward(x_pad, jnp.asarray(adj_blocks),
                          jnp.asarray(pool_blocks).astype(jnp.bfloat16),
                          w_aug1, b1, w_aug2, b2,
                          nb=NB, gpb=GPB, num_classes=C_OUT)
    out_pad = jax.block_until_ready(out_pad)
    out = out_pad[:, :C_OUT]

    assert out.shape == (G, C_OUT)
    assert bool(jnp.all(jnp.isfinite(out)))
    # log_softmax rows must (log-)sum to 1 over the real classes (exact final normalization)
    assert bool(jnp.allclose(jnp.sum(jnp.exp(out), axis=-1), 1.0, atol=1e-5))
    # Compare against pure-JAX f32 reference (loose tol: bf16 MXU + approx reciprocal)
    ref = _reference_forward(x, jnp.asarray(adj_full), jnp.asarray(pool_full), params)
    assert bool(jnp.allclose(out, ref, atol=0.15)), (out, ref)
    print("KERNEL_OK")
</pallas_src>

<mosaic_0001>
module attributes {stable_mosaic.version = 11 : i64} {
  func.func @gat_kernel(%arg0: i32, %arg1: memref<128x128xf32, #tpu.memory_space<vmem>>, %arg2: memref<1x128x128xi8, #tpu.memory_space<vmem>>, %arg3: memref<8x128xbf16, #tpu.memory_space<vmem>>, %arg4: memref<128x130xbf16, #tpu.memory_space<vmem>>, %arg5: memref<1x128xf32, #tpu.memory_space<vmem>>, %arg6: memref<128x130xbf16, #tpu.memory_space<vmem>>, %arg7: memref<1x128xf32, #tpu.memory_space<vmem>>, %arg8: memref<8x128xf32, #tpu.memory_space<vmem>>) attributes {dimension_semantics = [#tpu.dimension_semantics<parallel>], iteration_bounds = array<i64: 2>, scalar_prefetch = 0 : i64, scratch_operands = 0 : i64, tpu.core_type = #tpu.core_type<tc>, window_params = [{transform_indices = @transform_0, window_bounds = array<i64: 128, 128>}, {transform_indices = @transform_1, window_bounds = array<i64: 1, 128, 128>}, {transform_indices = @transform_2, window_bounds = array<i64: 8, 128>}, {pipeline_mode = #tpu.pipeline_mode<synchronous>, transform_indices = @transform_3, window_bounds = array<i64: 128, 130>}, {pipeline_mode = #tpu.pipeline_mode<synchronous>, transform_indices = @transform_4, window_bounds = array<i64: 1, 128>}, {pipeline_mode = #tpu.pipeline_mode<synchronous>, transform_indices = @transform_5, window_bounds = array<i64: 128, 130>}, {pipeline_mode = #tpu.pipeline_mode<synchronous>, transform_indices = @transform_6, window_bounds = array<i64: 1, 128>}, {transform_indices = @transform_7, window_bounds = array<i64: 8, 128>}]} {
    %c0 = arith.constant 0 : index
    %c0_0 = arith.constant 0 : index
    %c0_1 = arith.constant 0 : index
    %0 = vector.load %arg2[%c0, %c0_0, %c0_1] : memref<1x128x128xi8, #tpu.memory_space<vmem>>, vector<1x128x128xi8>
    %1 = vector.shape_cast %0 : vector<1x128x128xi8> to vector<128x128xi8>
    %2 = arith.sitofp %1 : vector<128x128xi8> to vector<128x128xf32>
    %c0_2 = arith.constant 0 : index
    %c0_3 = arith.constant 0 : index
    %3 = vector.load %arg1[%c0_2, %c0_3] : memref<128x128xf32, #tpu.memory_space<vmem>>, vector<128x128xf32>
    %4 = arith.truncf %3 : vector<128x128xf32> to vector<128x128xbf16>
    %c0_4 = arith.constant 0 : index
    %c0_5 = arith.constant 0 : index
    %5 = vector.load %arg4[%c0_4, %c0_5] : memref<128x130xbf16, #tpu.memory_space<vmem>>, vector<128x130xbf16>
    %c0_6 = arith.constant 0 : index
    %c0_7 = arith.constant 0 : index
    %6 = vector.load %arg5[%c0_6, %c0_7] : memref<1x128xf32, #tpu.memory_space<vmem>>, vector<1x128xf32>
    %cst = arith.constant dense<0.000000e+00> : vector<128x130xf32>
    %7 = tpu.matmul %4, %5, %cst {dimension_numbers = #tpu.dot_dimension_numbers<[1], [0], [0], [1], [0, 0, 1, 1], [], []>} : vector<128x128xbf16>, vector<128x130xbf16>, vector<128x130xf32> -> vector<128x130xf32>
    %8 = vector.extract_strided_slice %7 {offsets = [0, 0], sizes = [128, 128], strides = [1, 1]} : vector<128x130xf32> to vector<128x128xf32>
    %9 = vector.extract_strided_slice %7 {offsets = [0, 128], sizes = [128, 1], strides = [1, 1]} : vector<128x130xf32> to vector<128x1xf32>
    %10 = tpu.transpose %9, [1, 0] : vector<128x1xf32> -> vector<1x128xf32>
    %11 = vector.extract_strided_slice %7 {offsets = [0, 129], sizes = [128, 1], strides = [1, 1]} : vector<128x130xf32> to vector<128x1xf32>
    %12 = vector.broadcast %11 : vector<128x1xf32> to vector<128x128xf32>
    %13 = vector.broadcast %10 : vector<1x128xf32> to vector<128x128xf32>
    %14 = arith.addf %12, %13 : vector<128x128xf32>
    %cst_8 = arith.constant 0.000000e+00 : f32
    %15 = vector.broadcast %cst_8 : f32 to vector<128x128xf32>
    %16 = arith.cmpf ogt, %14, %15 : vector<128x128xf32>
    %cst_9 = arith.constant 2.000000e-01 : f32
    %17 = vector.broadcast %cst_9 : f32 to vector<128x128xf32>
    %18 = arith.mulf %17, %14 : vector<128x128xf32>
    %19 = arith.select %16, %14, %18 : vector<128x128xi1>, vector<128x128xf32>
    %cst_10 = arith.constant 0.000000e+00 : f32
    %20 = vector.broadcast %cst_10 : f32 to vector<128x128xf32>
    %21 = arith.cmpf ogt, %2, %20 : vector<128x128xf32>
    %cst_11 = arith.constant -1.000000e+30 : f32
    %22 = vector.broadcast %cst_11 : f32 to vector<128x128xf32>
    %23 = arith.select %21, %19, %22 : vector<128x128xi1>, vector<128x128xf32>
    %cst_12 = arith.constant dense<0xFF800000> : vector<128xf32>
    %24 = vector.multi_reduction <maximumf>, %23, %cst_12 [1] : vector<128x128xf32> to vector<128xf32>
    %25 = vector.shape_cast %24 : vector<128xf32> to vector<128x1xf32>
    %26 = vector.broadcast %25 : vector<128x1xf32> to vector<128x128xf32>
    %27 = arith.subf %23, %26 : vector<128x128xf32>
    %28 = math.exp %27 : vector<128x128xf32>
    %cst_13 = arith.constant dense<0.000000e+00> : vector<128xf32>
    %29 = vector.multi_reduction <add>, %28, %cst_13 [1] : vector<128x128xf32> to vector<128xf32>
    %30 = vector.shape_cast %29 : vector<128xf32> to vector<128x1xf32>
    %31 = tpu.reciprocal %30 {approx = true} : vector<128x1xf32> -> vector<128x1xf32>
    %32 = vector.broadcast %31 : vector<128x1xf32> to vector<128x128xf32>
    %33 = arith.mulf %28, %32 : vector<128x128xf32>
    %34 = arith.truncf %33 : vector<128x128xf32> to vector<128x128xbf16>
    %35 = arith.truncf %8 : vector<128x128xf32> to vector<128x128xbf16>
    %cst_14 = arith.constant dense<0.000000e+00> : vector<128x128xf32>
    %36 = tpu.matmul %34, %35, %cst_14 {dimension_numbers = #tpu.dot_dimension_numbers<[1], [0], [0], [1], [0, 0, 1, 1], [], []>} : vector<128x128xbf16>, vector<128x128xbf16>, vector<128x128xf32> -> vector<128x128xf32>
    %37 = vector.broadcast %6 : vector<1x128xf32> to vector<128x128xf32>
    %38 = arith.addf %36, %37 : vector<128x128xf32>
    %cst_15 = arith.constant 0.000000e+00 : f32
    %39 = vector.broadcast %cst_15 : f32 to vector<128x128xf32>
    %40 = arith.maximumf %38, %39 : vector<128x128xf32>
    %41 = arith.truncf %40 : vector<128x128xf32> to vector<128x128xbf16>
    %c0_16 = arith.constant 0 : index
    %c0_17 = arith.constant 0 : index
    %42 = vector.load %arg6[%c0_16, %c0_17] : memref<128x130xbf16, #tpu.memory_space<vmem>>, vector<128x130xbf16>
    %c0_18 = arith.constant 0 : index
    %c0_19 = arith.constant 0 : index
    %43 = vector.load %arg7[%c0_18, %c0_19] : memref<1x128xf32, #tpu.memory_space<vmem>>, vector<1x128xf32>
    %cst_20 = arith.constant dense<0.000000e+00> : vector<128x130xf32>
    %44 = tpu.matmul %41, %42, %cst_20 {dimension_numbers = #tpu.dot_dimension_numbers<[1], [0], [0], [1], [0, 0, 1, 1], [], []>} : vector<128x128xbf16>, vector<128x130xbf16>, vector<128x130xf32> -> vector<128x130xf32>
    %45 = vector.extract_strided_slice %44 {offsets = [0, 0], sizes = [128, 128], strides = [1, 1]} : vector<128x130xf32> to vector<128x128xf32>
    %46 = vector.extract_strided_slice %44 {offsets = [0, 128], sizes = [128, 1], strides = [1, 1]} : vector<128x130xf32> to vector<128x1xf32>
    %47 = tpu.transpose %46, [1, 0] : vector<128x1xf32> -> vector<1x128xf32>
    %48 = vector.extract_strided_slice %44 {offsets = [0, 129], sizes = [128, 1], strides = [1, 1]} : vector<128x130xf32> to vector<128x1xf32>
    %49 = vector.broadcast %48 : vector<128x1xf32> to vector<128x128xf32>
    %50 = vector.broadcast %47 : vector<1x128xf32> to vector<128x128xf32>
    %51 = arith.addf %49, %50 : vector<128x128xf32>
    %cst_21 = arith.constant 0.000000e+00 : f32
    %52 = vector.broadcast %cst_21 : f32 to vector<128x128xf32>
    %53 = arith.cmpf ogt, %51, %52 : vector<128x128xf32>
    %cst_22 = arith.constant 2.000000e-01 : f32
    %54 = vector.broadcast %cst_22 : f32 to vector<128x128xf32>
    %55 = arith.mulf %54, %51 : vector<128x128xf32>
    %56 = arith.select %53, %51, %55 : vector<128x128xi1>, vector<128x128xf32>
    %cst_23 = arith.constant 0.000000e+00 : f32
    %57 = vector.broadcast %cst_23 : f32 to vector<128x128xf32>
    %58 = arith.cmpf ogt, %2, %57 : vector<128x128xf32>
    %cst_24 = arith.constant -1.000000e+30 : f32
    %59 = vector.broadcast %cst_24 : f32 to vector<128x128xf32>
    %60 = arith.select %58, %56, %59 : vector<128x128xi1>, vector<128x128xf32>
    %cst_25 = arith.constant dense<0xFF800000> : vector<128xf32>
    %61 = vector.multi_reduction <maximumf>, %60, %cst_25 [1] : vector<128x128xf32> to vector<128xf32>
    %62 = vector.shape_cast %61 : vector<128xf32> to vector<128x1xf32>
    %63 = vector.broadcast %62 : vector<128x1xf32> to vector<128x128xf32>
    %64 = arith.subf %60, %63 : vector<128x128xf32>
    %65 = math.exp %64 : vector<128x128xf32>
    %cst_26 = arith.constant dense<0.000000e+00> : vector<128xf32>
    %66 = vector.multi_reduction <add>, %65, %cst_26 [1] : vector<128x128xf32> to vector<128xf32>
    %67 = vector.shape_cast %66 : vector<128xf32> to vector<128x1xf32>
    %68 = tpu.reciprocal %67 {approx = true} : vector<128x1xf32> -> vector<128x1xf32>
    %69 = vector.broadcast %68 : vector<128x1xf32> to vector<128x128xf32>
    %70 = arith.mulf %65, %69 : vector<128x128xf32>
    %71 = arith.truncf %70 : vector<128x128xf32> to vector<128x128xbf16>
    %72 = arith.truncf %45 : vector<128x128xf32> to vector<128x128xbf16>
    %cst_27 = arith.constant dense<0.000000e+00> : vector<128x128xf32>
    %73 = tpu.matmul %71, %72, %cst_27 {dimension_numbers = #tpu.dot_dimension_numbers<[1], [0], [0], [1], [0, 0, 1, 1], [], []>} : vector<128x128xbf16>, vector<128x128xbf16>, vector<128x128xf32> -> vector<128x128xf32>
    %74 = vector.broadcast %43 : vector<1x128xf32> to vector<128x128xf32>
    %75 = arith.addf %73, %74 : vector<128x128xf32>
    %c0_28 = arith.constant 0 : index
    %c0_29 = arith.constant 0 : index
    %76 = vector.load %arg3[%c0_28, %c0_29] : memref<8x128xbf16, #tpu.memory_space<vmem>>, vector<8x128xbf16>
    %77 = arith.truncf %75 : vector<128x128xf32> to vector<128x128xbf16>
    %cst_30 = arith.constant dense<0.000000e+00> : vector<8x128xf32>
    %78 = tpu.matmul %76, %77, %cst_30 {dimension_numbers = #tpu.dot_dimension_numbers<[1], [0], [0], [1], [0, 0, 1, 1], [], []>} : vector<8x128xbf16>, vector<128x128xbf16>, vector<8x128xf32> -> vector<8x128xf32>
    %79 = tpu.iota {dimensions = array<i32: 1>} : vector<1x128xi32>
    %c4_i32 = arith.constant 4 : i32
    %80 = vector.broadcast %c4_i32 : i32 to vector<1x128xi32>
    %81 = arith.cmpi slt, %79, %80 : vector<1x128xi32>
    %cst_31 = arith.constant -1.000000e+30 : f32
    %82 = vector.shape_cast %81 : vector<1x128xi1> to vector<1x128xi1>
    %83 = vector.broadcast %82 : vector<1x128xi1> to vector<8x128xi1>
    %84 = vector.broadcast %cst_31 : f32 to vector<8x128xf32>
    %85 = arith.select %83, %78, %84 : vector<8x128xi1>, vector<8x128xf32>
    %cst_32 = arith.constant dense<0xFF800000> : vector<8xf32>
    %86 = vector.multi_reduction <maximumf>, %85, %cst_32 [1] : vector<8x128xf32> to vector<8xf32>
    %87 = vector.shape_cast %86 : vector<8xf32> to vector<8x1xf32>
    %88 = vector.broadcast %87 : vector<8x1xf32> to vector<8x128xf32>
    %89 = arith.subf %85, %88 : vector<8x128xf32>
    %90 = math.exp %89 : vector<8x128xf32>
    %cst_33 = arith.constant dense<0.000000e+00> : vector<8xf32>
    %91 = vector.multi_reduction <add>, %90, %cst_33 [1] : vector<8x128xf32> to vector<8xf32>
    %92 = vector.shape_cast %91 : vector<8xf32> to vector<8x1xf32>
    %93 = math.log %92 : vector<8x1xf32>
    %94 = arith.addf %93, %87 : vector<8x1xf32>
    %95 = vector.broadcast %94 : vector<8x1xf32> to vector<8x128xf32>
    %96 = arith.subf %85, %95 : vector<8x128xf32>
    %c0_34 = arith.constant 0 : index
    %c0_35 = arith.constant 0 : index
    %97 = vector.load %arg8[%c0_34, %c0_35] : memref<8x128xf32, #tpu.memory_space<vmem>>, vector<8x128xf32>
    tpu.vector_store %arg8[%c0_34, %c0_35], %96 {strides = array<i32>} : memref<8x128xf32, #tpu.memory_space<vmem>>, vector<8x128xf32>,
    return
  }
  func.func @transform_0(%arg0: i32) -> (i32, i32) {
    %c0_i32 = arith.constant 0 : i32
    %c0_i32_0 = arith.constant 0 : i32
    return %arg0, %c0_i32 : i32, i32
  }
  func.func @transform_1(%arg0: i32) -> (i32, i32, i32) {
    %c0_i32 = arith.constant 0 : i32
    %c0_i32_0 = arith.constant 0 : i32
    %c0_i32_1 = arith.constant 0 : i32
    return %arg0, %c0_i32, %c0_i32_0 : i32, i32, i32
  }
  func.func @transform_2(%arg0: i32) -> (i32, i32) {
    %c0_i32 = arith.constant 0 : i32
    %c0_i32_0 = arith.constant 0 : i32
    return %arg0, %c0_i32 : i32, i32
  }
  func.func @transform_3(%arg0: i32) -> (i32, i32) {
    %c0_i32 = arith.constant 0 : i32
    %c0_i32_0 = arith.constant 0 : i32
    %c0_i32_1 = arith.constant 0 : i32
    return %c0_i32, %c0_i32_0 : i32, i32
  }
  func.func @transform_4(%arg0: i32) -> (i32, i32) {
    %c0_i32 = arith.constant 0 : i32
    %c0_i32_0 = arith.constant 0 : i32
    %c0_i32_1 = arith.constant 0 : i32
    return %c0_i32, %c0_i32_0 : i32, i32
  }
  func.func @transform_5(%arg0: i32) -> (i32, i32) {
    %c0_i32 = arith.constant 0 : i32
    %c0_i32_0 = arith.constant 0 : i32
    %c0_i32_1 = arith.constant 0 : i32
    return %c0_i32, %c0_i32_0 : i32, i32
  }
  func.func @transform_6(%arg0: i32) -> (i32, i32) {
    %c0_i32 = arith.constant 0 : i32
    %c0_i32_0 = arith.constant 0 : i32
    %c0_i32_1 = arith.constant 0 : i32
    return %c0_i32, %c0_i32_0 : i32, i32
  }
  func.func @transform_7(%arg0: i32) -> (i32, i32) {
    %c0_i32 = arith.constant 0 : i32
    %c0_i32_0 = arith.constant 0 : i32
    return %arg0, %c0_i32 : i32, i32
  }
}

</mosaic_0001>

<bundles_post_ra>
// kernel: tpu_custom_call.1
= control target key start
LH: loop header
LB: loop body
LE: loop exit
PB: predicated region body
PF: predicated region fallthrough
CT: control target
= control target key end

     0   :  { %12 = vsyncpa [#allocation3], 0  ;;  %s3273_s0 = inlined_call_operand.vmem [shape: f32[256,128], index: 0, kind: input, shape index: {}]   ;;  %s3274_s1 = inlined_call_operand.vmem [shape: s8[2,128,128], index: 1, kind: input, shape index: {}]   ;;  %s3275_s2 = inlined_call_operand.hbm [shape: bf16[16,128], index: 2, kind: input, shape index: {}]   ;;  %s3276_s3 = inlined_call_operand.vmem [shape: bf16[128,130], index: 3, kind: input, shape index: {}]   ;;  %s3277_s4 = inlined_call_operand.vmem [shape: f32[1,128], index: 4, kind: input, shape index: {}]   ;;  %s3278_s5 = inlined_call_operand.vmem [shape: bf16[128,130], index: 5, kind: input, shape index: {}]   ;;  %s3279_s6 = inlined_call_operand.vmem [shape: f32[1,128], index: 6, kind: input, shape index: {}]   ;;  %s3280_s7 = inlined_call_operand.hbm [shape: f32[16,128], index: 7, kind: output, shape index: {}]  }
   0x1   :  { %14 = vsyncpa [#allocation3 + $0x1], 0 }
   0x2   :  { %15 = vsyncpa [#allocation4], 0 }
   0x3   :  { %17 = vsyncpa [#allocation4 + $0x1], 0  ;;  %s2498_s24 = smov 0   ;;  %s2500_s25 = smov 0  }
   0x4   :  { %s2502_s26 = smov 0   ;;  %s2504_s27 = smov 0  }
   0x5 LB: > { %s2519_s28 = sadd.s32 4294967295, %s2450_s27   ;;  %s1950_s29 = sadd.s32 4294967294, %s2450_s27   ;;  %s2450_s27 = sphi %s2504_s27, %s3305_s27   ;;  %s2446_s26 = sphi %s2502_s26, %s3304_s26   ;;  %s2442_s25 = sphi %s2500_s25, %s3303_s25   ;;  %s2438_s24 = sphi %s2498_s24, %s3302_s24  }
   0x6   : > { %s2523_s30 = sadd.s32 1, %s2450_s27   ;;  %s82_s8 = sadd.s32 1, %s2446_s26 }
   0x7   : > { %s79_s9 = ssub.s32 %s2450_s27, %s2523_s30  ;;  %p89_p0 = scmp.ne.s32.totalorder %s2446_s26, %s2442_s25 }
   0x8   : > { %p80_p1 = scmp.eq.s32.totalorder %s79_s9, 0  ;;  %p90_p2 = scmp.eq.s32.totalorder %s2450_s27, 0 }
   0x9   : > { %p95_p3 = scmp.ne.s32.totalorder %s2442_s25, %s2438_s24  ;;  %p96_p4 = scmp.eq.s32.totalorder %s2519_s28, 0 }
   0xa   : > { %s2535_s10 = scalar_select %p80_p1, %s2446_s26, %s82_s8  }
   0xb   : > { %p2537_p5 = por %p90_p2, %p89_p0  ;;  %p2541_p6 = por %p96_p4, %p95_p3 }
   0xc   : > { %p203_p7 = scmp.eq.s32.totalorder %s2519_s28, 1  ;;  %p209_p8 = scmp.eq.s32.totalorder %s1950_s29, 1 }
   0xd   : > { %s3288_s12 = scalar_select %p2541_p6, 1, 0 }
   0xe   : > { %p2138_p10 = scmp.lt.s32.totalorder %s2450_s27, 2  ;;  %p2548_p11 = por %p203_p7, %p89_p0 }
   0xf   : > { %p2552_p12 = por %p209_p8, %p95_p3  ;;  %s258_s15 = sand.u32 1, %s2446_s26  }
  0x10   : > { %s3289_s13 = scalar_select %p2548_p11, 1, 0 }
  0x11   : > { %s3290_s14 = scalar_select %p2552_p12, 1, 0 }
  0x12   : > { %s1954_s16 = sshll.u32 %s2450_s27, 6  ;;  %s1953_s17 = sshll.u32 %s258_s15, 2 }
  0x13   : > { %s2561_s20 = scalar_lea.hbm %s3275_s2, %s1954_s16  ;;  %s262_s21 = scalar_lea.vmem [#allocation2], %s1953_s17 }
  0x14   : > { %s269_s22 = sshll.u32 %s262_s21, 4  ;;  %p2565_p13 = pnand %p2138_p10, %p2537_p5  ;;  %s2569_s22 = int_to_ptr.vmem [resolvable:$true] %s269_s22 }
  0x15   : > { %s259_s29 = scalar_lea.sflag [#allocation3], %s258_s15  ;;  %s2358_s8 = scalar_lea.hbm %s2561_s20, 64 }
  0x16   : > { %p2359_p2 = scmp.ne.s32.totalorder %s2561_s20, %s2358_s8  ;;  %p2360_p3 = pneg %p2565_p13 }
  0x17   : > { %s2363_s11 = scalar_lea.hbm %s3275_s2, 128  ;;  %p2364_p5 = scmp.lt.s32.totalorder %s2561_s20, %s3275_s2 }
  0x18   : > { %p2361_p4 = pnand %p2360_p3, %p2359_p2  ;;  %p2365_p8 = scmp.lt.s32.totalorder %s2363_s11, %s2358_s8 }
  0x1a   : > { %p2362_p7 = pneg %p2361_p4  ;;  %p2366_p10 = por %p2365_p8, %p2364_p5 }
  0x1c   : > { %p2367_p9 = pnand %p2366_p10, %p2362_p7 }
  0x1e   : > { %2370 = shalt.err (!%p2367_p9)
}
  0x1f   : > { %s2371_s15 = scalar_lea.vmem %s2569_s22, 64  ;;  %s2452_s19 = smov [#allocation2]  }
  0x20   : > { %p2372_p0 = scmp.ne.s32.totalorder %s2569_s22, %s2371_s15  ;;  %s2376_s21 = sshll.u32 %s2452_s19, 4  ;;  %s2377_s21 = int_to_ptr.vmem [resolvable:$false] %s2376_s21 }
  0x21   : > { %s2378_s9 = scalar_lea.vmem %s2377_s21, 128  ;;  %p2379_p4 = scmp.lt.s32.totalorder %s2569_s22, %s2377_s21 }
  0x22   : > { %p2374_p1 = pnand %p2372_p0, %p2360_p3  ;;  %p2380_p12 = scmp.lt.s32.totalorder %s2378_s9, %s2371_s15 }
  0x24   : > { %p2375_p2 = pneg %p2374_p1  ;;  %p2381_p11 = por %p2380_p12, %p2379_p4 }
  0x26   : > { %p2382_p6 = pnand %p2381_p11, %p2375_p2 }
  0x28   : > { %2385 = shalt.err (!%p2382_p6)
}
  0x29   : > { %2133 = dma.hbm_to_vmem [thread:$0]  (!%p2565_p13), %s2561_s20, 64, %s2569_s22, %s259_s29  }
  0x2a   : > { %p3292_p9 = scmp.lt.s32.totalorder %s2450_s27, 3  ;;  %p3293_p7 = scmp.ge.s32.totalorder %s2450_s27, 1 }
  0x2c   : > { %p275_p0 = pnand %p3293_p7, %p3292_p9 }
  0x2d   : > { %s2596_s8 = sand.u32 (!%p275_p0), 1, %s2442_s25   ;;  %p3294_p6 = scmp.ne.s32.totalorder (!%p275_p0), %s3288_s12, 0 }
  0x2e   : > { %278 = sbr.rel (%p275_p0) target bundleno = 2532 (0x9e4), region = 48  ;;  %s1956_s16 = sshll.u32 (!%p275_p0), %s2596_s8, 2 }
  0x2f   : > { %s281_s11 = scalar_lea.sflag (!%p275_p0), [#allocation3], %s2596_s8  ;;  %s2600_s17 = scalar_lea.vmem (!%p275_p0), [#allocation2], %s1956_s16 }
  0x33   : > { %2429 = dma.done.wait (%p3294_p6), %s281_s11, 64  }
  0x34   : > { %2431 = vsyncadd (%p3294_p6), %s281_s11, 4294967232  ;;  %v2453_v0 = vmov 0   ;;  %v2178_v1 = vld [vmem:[%s3276_s3 + $0x74] ss:$8 sps:$4 sm:$0xff]   ;;  %v2180_v2 = vld [vmem:[%s3276_s3 + $0x70] ss:$8 sps:$4 sm:$0xff]  }
  0x35   : > { %526 = vmatprep.mubr.bf16.mxu0 %v2453_v0  ;;  %494 = vmatprep.subr.bf16.mxu0 %v2178_v1  ;;  %v2181_v3 = vld [vmem:[%s3276_s3 + $0x64] ss:$8 sps:$4 sm:$0xff]   ;;  %v2183_v4 = vld [vmem:[%s3276_s3 + $0x60] ss:$8 sps:$4 sm:$0xff]   ;;  %v2184_v5 = vld [vmem:[%s3276_s3 + $0x54] ss:$8 sps:$4 sm:$0xff]  }
  0x36   : > { %495 = vmatpush1.bf16.msra.mxu0 %v2180_v2  ;;  %v2186_v6 = vld [vmem:[%s3276_s3 + $0x50] ss:$8 sps:$4 sm:$0xff]   ;;  %v2187_v7 = vld [vmem:[%s3276_s3 + $0x44] ss:$8 sps:$4 sm:$0xff]   ;;  %s1958_s23 = sshll.u32 %s2519_s28, 4  ;;  %v2454_v41 = vmov 1  }
  0x37   : > { %496 = vmatprep.subr.bf16.mxu0 %v2181_v3  ;;  %v2189_v8 = vld [vmem:[%s3276_s3 + $0x40] ss:$8 sps:$4 sm:$0xff]   ;;  %v2190_v9 = vld [vmem:[%s3276_s3 + $0x34] ss:$8 sps:$4 sm:$0xff]   ;;  %p326_p11 = scmp.lt.s32.totalorder %s1958_s23, 31  ;;  %2176 = vset.pattern.permute.xlu0 %v2454_v41  ;;  %p331_p12 = scmp.lt.s32.totalorder %s2519_s28, 1 }
  0x38   : > { %v2192_v10 = vld [vmem:[%s3276_s3 + $0x30] ss:$8 sps:$4 sm:$0xff]   ;;  %v2193_v11 = vld [vmem:[%s3276_s3 + $0x24] ss:$8 sps:$4 sm:$0xff]   ;;  %v2195_v12 = vld [vmem:[%s3276_s3 + $0x20] ss:$8 sps:$4 sm:$0xff]   ;;  %2177 = vset.pattern.permute.xlu1 %v2454_v41 }
  0x39   : > { %s3307_s23 = smov (!%p326_p11, %s1958_s23), 31  ;;  %v2196_v13 = vld [vmem:[%s3276_s3 + $0x14] ss:$8 sps:$4 sm:$0xff]   ;;  %v2198_v14 = vld [vmem:[%s3276_s3 + $0x10] ss:$8 sps:$4 sm:$0xff]   ;;  %s1997_s19 = sshll.u32 %s2519_s28, 7 }
  0x3a   : > { %497 = vmatpush1.bf16.msra.mxu0 %v2183_v4  ;;  %s1959_s18 = sshll.u32 %s3307_s23, 3  ;;  %v2199_v15 = vld [vmem:[%s3276_s3 + $0x4] ss:$8 sps:$4 sm:$0xff]   ;;  %v2201_v16 = vld [vmem:[%s3276_s3] ss:$8 sps:$4 sm:$0xff]   ;;  %s1854_s23 = scalar_lea.hbm %s3280_s7, %s1997_s19 }
  0x3b   : > { %498 = vmatprep.subr.bf16.mxu0 %v2184_v5  ;;  %s2656_s11 = scalar_lea.vmem %s3273_s0, %s1959_s18  ;;  %s1843_s20 = scalar_lea.sflag [#allocation4], %s2596_s8 }
  0x3c   : > { %v373_v17 = vld [vmem:[%s2656_s11] sm:$0xff]  ;;  %v374_v18 = vld [vmem:[%s2656_s11 + $0x8] sm:$0xff]  ;;  %v375_v20 = vld [vmem:[%s2656_s11 + $0x10] sm:$0xff]  ;;  %s332_s22 = scalar_select %p331_p12, %s2519_s28, 1 }
  0x3d   : > { %v389_v19 = vpack.c.bf16 %v374_v18, %v373_v17  ;;  %v376_v21 = vld [vmem:[%s2656_s11 + $0x18] sm:$0xff]  ;;  %v377_v23 = vld [vmem:[%s2656_s11 + $0x20] sm:$0xff]  ;;  %v378_v24 = vld [vmem:[%s2656_s11 + $0x28] sm:$0xff]  ;;  %p3299_p1 = scmp.ne.s32.totalorder %s3289_s13, 0 }
  0x3e   : > { %499 = vmatpush1.bf16.msra.mxu0 %v2186_v6  ;;  %v390_v22 = vpack.c.bf16 %v376_v21, %v375_v20  ;;  %v391_v25 = vpack.c.bf16 %v378_v24, %v377_v23  ;;  %v379_v26 = vld [vmem:[%s2656_s11 + $0x30] sm:$0xff]  ;;  %v380_v27 = vld [vmem:[%s2656_s11 + $0x38] sm:$0xff]  ;;  %v381_v29 = vld [vmem:[%s2656_s11 + $0x40] sm:$0xff]  ;;  %s2000_s29 = sshll.u32 %s332_s22, 5 }
  0x3f   : > { %500 = vmatprep.subr.bf16.mxu0 %v2187_v7  ;;  %v392_v28 = vpack.c.bf16 %v380_v27, %v379_v26  ;;  %v382_v30 = vld [vmem:[%s2656_s11 + $0x48] sm:$0xff]  ;;  %v383_v32 = vld [vmem:[%s2656_s11 + $0x50] sm:$0xff]  ;;  %v384_v33 = vld [vmem:[%s2656_s11 + $0x58] sm:$0xff]  ;;  %s2697_s12 = scalar_lea.vmem %s3274_s1, %s2000_s29  ;;  %s2457_s29 = smov [#allocation5]  }
  0x40   : > { %v393_v31 = vpack.c.bf16 %v382_v30, %v381_v29  ;;  %v394_v34 = vpack.c.bf16 %v384_v33, %v383_v32  ;;  %v385_v35 = vld [vmem:[%s2656_s11 + $0x60] sm:$0xff]  ;;  %v386_v36 = vld [vmem:[%s2656_s11 + $0x68] sm:$0xff]  ;;  %v387_v38 = vld [vmem:[%s2656_s11 + $0x70] sm:$0xff]  ;;  %s2390_s18 = sshll.u32 %s2457_s29, 4  ;;  %s2391_s18 = int_to_ptr.vmem [resolvable:$false] %s2390_s18 }
  0x41   : > { %v395_v37 = vpack.c.bf16 %v386_v36, %v385_v35  ;;  %v388_v39 = vld [vmem:[%s2656_s11 + $0x78] sm:$0xff]  ;;  %v337_v26 = vld [vmem:[%s2697_s12] sm:$0xff]  ;;  %s2392_s28 = scalar_lea.vmem %s2391_s18, 256 }
  0x42   : > { %501 = vmatpush1.bf16.msra.mxu0 %v2189_v8  ;;  %v396_v40 = vpack.c.bf16 %v388_v39, %v387_v38  ;;  %v341_v30 = vunpack.c.0.s8 %v337_v26  ;;  %v342_v36 = vunpack.c.1.s8 %v337_v26 }
  0x43   : > { %502 = vmatprep.subr.bf16.mxu0 %v2190_v9 }
  0x44   : > { %v2712_v35 = vcvt.s32.f32 %v341_v30 }
  0x46   : > { %503 = vmatpush1.bf16.msra.mxu0 %v2192_v10  ;;  %vm787_vm1 = vcmp.gt.f32.partialorder %v2712_v35, 0.0 }
  0x47   : > { %504 = vmatprep.subr.bf16.mxu0 %v2193_v11 }
  0x4a   : > { %505 = vmatpush1.bf16.msra.mxu0 %v2195_v12 }
  0x4b   : > { %506 = vmatprep.subr.bf16.mxu0 %v2196_v13 }
  0x4e   : > { %507 = vmatpush1.bf16.msra.mxu0 %v2198_v14 }
  0x4f   : > { %508 = vmatprep.subr.bf16.mxu0 %v2199_v15 }
  0x52   : > { %509 = vmatpush1.bf16.msra.mxu0 %v2201_v16 }
  0x55   : > { %527 = vmatmul.mubr.bf16.vlgmr.msra.gmra.mxu0 %v389_v19 }
  0x56   : > { %536 = vmatprep.mubr.bf16.mxu0 %v2453_v0 }
  0x5d   : > { %537 = vmatmul.mubr.bf16.gmra.mxu0 %v390_v22  ;;  %v719_v22 = vlaneseq }
  0x5e   : > { %546 = vmatprep.mubr.bf16.mxu0 %v2453_v0 }
  0x5f   : > { %v2700_v24 = vshrl.u32 %v719_v22, 7 }
  0x65   : > { %547 = vmatmul.mubr.bf16.gmra.mxu0 %v391_v25  ;;  %v2703_v25 = vld [vmem:[%s2697_s12 + $0x8] sm:$0xff] }
  0x66   : > { %556 = vmatprep.mubr.bf16.mxu0 %v2453_v0  ;;  %v348_v29 = vunpack.c.3.s8 %v2703_v25 }
  0x6d   : > { %557 = vmatmul.mubr.bf16.gmra.mxu0 %v392_v28 }
  0x6e   : > { %566 = vmatprep.mubr.bf16.mxu0 %v2453_v0 }
  0x75   : > { %567 = vmatmul.mubr.bf16.gmra.mxu0 %v393_v31  ;;  %v721_v31 = vsub.s32 0, %v2700_v24 }
  0x76   : > { %576 = vmatprep.mubr.bf16.mxu0 %v2453_v0 }
  0x7d   : > { %577 = vmatmul.mubr.bf16.gmra.mxu0 %v394_v34  ;;  %v2710_v34 = vcvt.s32.f32 %v348_v29 }
  0x7e   : > { %586 = vmatprep.mubr.bf16.mxu0 %v2453_v0 }
  0x7f   : > { %vm794_vm0 = vcmp.gt.f32.partialorder %v2710_v34, 0.0 }
  0x85   : > { %587 = vmatmul.mubr.bf16.gmra.mxu0 %v395_v37 }
  0x86   : > { %596 = vmatprep.mubr.bf16.mxu0 %v2453_v0 }
  0x8d   : > { %597 = vmatmul.mubr.bf16.gmra.mxu0 %v396_v40 }
 0x115   : > { %v528_v42 = vpop.f32.mrf.mxu0 }
 0x117   : > { %v530_v43 = vpop.f32.mrf.mxu0 }
 0x118   : > { %641 = vperm.xlu0 %2176, %v530_v43  }
 0x119   : > { %v532_v44 = vpop.f32.mrf.mxu0 }
 0x11a   : > { %v2684_v45 = vpack.c.bf16 %v532_v44, %v528_v42  ;;  %v343_v42 = vunpack.c.2.s8 %v337_v26 }
 0x11b   : > { %v534_v46 = vpop.f32.mrf.mxu0 }
 0x11c   : > { %646 = vperm.xlu0 %2176, %v534_v46  }
 0x11d   : > { %v538_v47 = vpop.f32.mrf.mxu0 }
 0x11f   : > { %v540_v48 = vpop.f32.mrf.mxu0 }
 0x120   : > { %651 = vperm.xlu1 %2177, %v540_v48  }
 0x121   : > { %v542_v49 = vpop.f32.mrf.mxu0 }
 0x122   : > { %v2686_v50 = vpack.c.bf16 %v542_v49, %v538_v47 }
 0x123   : > { %v544_v51 = vpop.f32.mrf.mxu0 }
 0x124   : > { %656 = vperm.xlu1 %2177, %v544_v51  }
 0x125   : > { %v548_v52 = vpop.f32.mrf.mxu0 }
 0x127   : > { %v550_v53 = vpop.f32.mrf.mxu0 }
 0x128   : > { %661 = vperm.xlu0 %2176, %v550_v53  }
 0x129   : > { %v552_v54 = vpop.f32.mrf.mxu0 }
 0x12a   : > { %v973_v18 = vpack.c.bf16 %v552_v54, %v548_v52  ;;  %v344_v54 = vunpack.c.3.s8 %v337_v26 }
 0x12b   : > { %v554_v55 = vpop.f32.mrf.mxu0 }
 0x12c   : > { %666 = vperm.xlu1 %2177, %v554_v55  }
 0x12d   : > { %v558_v56 = vpop.f32.mrf.mxu0 }
 0x12f   : > { %v560_v57 = vpop.f32.mrf.mxu0 }
 0x130   : > { %671 = vperm.xlu0 %2176, %v560_v57  }
 0x131   : > { %v562_v58 = vpop.f32.mrf.mxu0 }
 0x132   : > { %v974_v17 = vpack.c.bf16 %v562_v58, %v558_v56 }
 0x133   : > { %v564_v59 = vpop.f32.mrf.mxu0 }
 0x134   : > { %676 = vperm.xlu1 %2177, %v564_v59  }
 0x135   : > { %v568_v60 = vpop.f32.mrf.mxu0 }
 0x137   : > { %v570_v61 = vpop.f32.mrf.mxu0 }
 0x138   : > { %681 = vperm.xlu1 %2177, %v570_v61  }
 0x139   : > { %v572_v62 = vpop.f32.mrf.mxu0 }
 0x13a   : > { %v975_v16 = vpack.c.bf16 %v572_v62, %v568_v60  ;;  %v345_v60 = vunpack.c.0.s8 %v2703_v25 }
 0x13b   : > { %v574_v63 = vpop.f32.mrf.mxu0 }
 0x13c   : > { %686 = vperm.xlu1 %2177, %v574_v63  }
 0x13d   : > { %v578_v1 = vpop.f32.mrf.mxu0 }
 0x13f   : > { %v580_v2 = vpop.f32.mrf.mxu0 }
 0x140   : > { %691 = vperm.xlu1 %2177, %v580_v2  }
 0x141   : > { %v582_v3 = vpop.f32.mrf.mxu0 }
 0x142   : > { %v976_v15 = vpack.c.bf16 %v582_v3, %v578_v1  ;;  %v2754_v3 = vcvt.s32.f32 %v345_v60 }
 0x143   : > { %v584_v4 = vpop.f32.mrf.mxu0 }
 0x144   : > { %696 = vperm.xlu1 %2177, %v584_v4   ;;  %vm791_vm11 = vcmp.gt.f32.partialorder %v2754_v3, 0.0 }
 0x145   : > { %v588_v5 = vpop.f32.mrf.mxu0 }
 0x147   : > { %v590_v6 = vpop.f32.mrf.mxu0 }
 0x148   : > { %701 = vperm.xlu1 %2177, %v590_v6  }
 0x149   : > { %v592_v7 = vpop.f32.mrf.mxu0 }
 0x14a   : > { %v977_v12 = vpack.c.bf16 %v592_v7, %v588_v5 }
 0x14b   : > { %v594_v8 = vpop.f32.mrf.mxu0 }
 0x14c   : > { %706 = vperm.xlu1 %2177, %v594_v8  }
 0x14d   : > { %v598_v9 = vpop.f32.mrf.mxu0 }
 0x14e   : > { %607 = vxpose.xlu0.b32.start [1/16] (narrow) %v530_v43, 8  ;;  %v2723_v43 = vcvt.s32.f32 %v342_v36 }
 0x14f   : > { %v600_v10 = vpop.f32.mrf.mxu0 }
 0x150   : > { %711 = vperm.xlu1 %2177, %v600_v10   ;;  %vm788_vm5 = vcmp.gt.f32.partialorder %v2723_v43, 0.0 }
 0x151   : > { %v602_v11 = vpop.f32.mrf.mxu0 }
 0x152   : > { %v978_v13 = vpack.c.bf16 %v602_v11, %v598_v9  ;;  %608 = vxpose.xlu0.b32.cont [2/16] (narrow) %v534_v46, 8  ;;  %v347_v11 = vunpack.c.2.s8 %v2703_v25 }
 0x153   : > { %v604_v14 = vpop.f32.mrf.mxu0 }
 0x154   : > { %2042 = vmatprep.subr.bf16.mxu1 %v978_v13  ;;  %716 = vperm.xlu1 %2177, %v604_v14  }
 0x155   : > { %2043 = vmatpush3.bf16.msra.mxu1 %v978_v13 }
 0x156   : > { %609 = vxpose.xlu0.b32.cont [3/16] (narrow) %v540_v48, 8  ;;  %2044 = vmatprep.subr.bf16.mxu1 %v977_v12 }
 0x159   : > { %2045 = vmatpush3.bf16.msra.mxu1 %v977_v12 }
 0x15a   : > { %610 = vxpose.xlu0.b32.cont [4/16] (narrow) %v544_v51, 8  ;;  %2046 = vmatprep.subr.bf16.mxu1 %v976_v15 }
 0x15d   : > { %2047 = vmatpush3.bf16.msra.mxu1 %v976_v15  ;;  %v339_v15 = vld [vmem:[%s2697_s12 + $0x10] sm:$0xff] }
 0x15e   : > { %611 = vxpose.xlu0.b32.cont [5/16] (narrow) %v550_v53, 8  ;;  %2048 = vmatprep.subr.bf16.mxu1 %v975_v16  ;;  %v2734_v53 = vcvt.s32.f32 %v343_v42 }
 0x160   : > { %vm789_vm7 = vcmp.gt.f32.partialorder %v2734_v53, 0.0 }
 0x161   : > { %2049 = vmatpush3.bf16.msra.mxu1 %v975_v16 }
 0x162   : > { %612 = vxpose.xlu0.b32.cont [6/16] (narrow) %v554_v55, 8  ;;  %2050 = vmatprep.subr.bf16.mxu1 %v974_v17 }
 0x165   : > { %2051 = vmatpush3.bf16.msra.mxu1 %v974_v17  ;;  %v2776_v17 = vcvt.s32.f32 %v347_v11 }
 0x166   : > { %613 = vxpose.xlu0.b32.cont [7/16] (narrow) %v560_v57, 8  ;;  %2052 = vmatprep.subr.bf16.mxu1 %v973_v18 }
 0x167   : > { %vm793_vm15 = vcmp.gt.f32.partialorder %v2776_v17, 0.0 }
 0x169   : > { %2053 = vmatpush3.bf16.msra.mxu1 %v973_v18  ;;  %v349_v18 = vunpack.c.0.s8 %v339_v15 }
 0x16a   : > { %614 = vxpose.xlu0.b32.cont [8/16] (narrow) %v564_v59, 8  ;;  %2054 = vmatprep.subr.bf16.mxu1 %v2686_v50  ;;  %v2744_v59 = vcvt.s32.f32 %v344_v54 }
 0x16b   : > { %v2785_v26 = vcvt.s32.f32 %v349_v18 }
 0x16c   : > { %vm790_vm9 = vcmp.gt.f32.partialorder %v2744_v59, 0.0 }
 0x16d   : > { %2055 = vmatpush3.bf16.msra.mxu1 %v2686_v50 }
 0x16e   : > { %615 = vxpose.xlu0.b32.cont [9/16] (narrow) %v570_v61, 8  ;;  %2056 = vmatprep.subr.bf16.mxu1 %v2684_v45 }
 0x171   : > { %2057 = vmatpush3.bf16.msra.mxu1 %v2684_v45 }
 0x172   : > { %616 = vxpose.xlu0.b32.cont [10/16] (narrow) %v574_v63, 8 }
 0x176   : > { %617 = vxpose.xlu0.b32.cont [11/16] (narrow) %v580_v2, 8 }
 0x17a   : > { %618 = vxpose.xlu0.b32.cont [12/16] (narrow) %v584_v4, 8  ;;  %v346_v4 = vunpack.c.1.s8 %v2703_v25 }
 0x17e   : > { %619 = vxpose.xlu0.b32.cont [13/16] (narrow) %v590_v6, 8 }
 0x182   : > { %620 = vxpose.xlu0.b32.cont [14/16] (narrow) %v594_v8, 8 }
 0x186   : > { %621 = vxpose.xlu0.b32.cont [15/16] (narrow) %v600_v10, 8  ;;  %v2764_v10 = vcvt.s32.f32 %v346_v4 }
 0x188   : > { %vm792_vm13 = vcmp.gt.f32.partialorder %v2764_v10, 0.0 }
 0x18a   : > { %622 = vxpose.xlu0.b32.end [16/16] (narrow) %v604_v14, 8 }
 0x193   : > { %v642_v19 = vpop.permute.xlu0 %641 }
 0x197   : > { %v647_v20 = vpop.permute.xlu0 %646 }
 0x19b   : > { %v652_v21 = vpop.permute.xlu1 %651 }
 0x19f   : > { %v657_v27 = vpop.permute.xlu1 %656 }
 0x1a3   : > { %v662_v23 = vpop.permute.xlu0 %661 }
 0x1a7   : > { %v667_v32 = vpop.permute.xlu1 %666 }
 0x1ab   : > { %v2706_v28 = vpop.permute.xlu0 %671 }
 0x1af   : > { %v677_v38 = vpop.permute.xlu1 %676 }
 0x1b3   : > { %v682_v50 = vpop.permute.xlu1 %681 }
 0x1b7   : > { %v687_v1 = vpop.permute.xlu1 %686 }
 0x1bb   : > { %v692_v8 = vpop.permute.xlu1 %691 }
 0x1ca   : > { %v623_v33 = vpop.trf.xlu0 }
 0x1cb   : > { %v2716_v37 = vrot.slane %v623_v33, %v721_v31 }
 0x1cd   : > { %v730_v39 = vadd.f32 %v2716_v37, %v677_v38  ;;  %v723_v40 = vadd.f32 %v2716_v37, %v642_v19  ;;  %v724_v41 = vadd.f32 %v2716_v37, %v647_v20  ;;  %v725_v44 = vadd.f32 %v2716_v37, %v652_v21 }
 0x1ce   : > { %v726_v57 = vadd.f32 %v2716_v37, %v657_v27  ;;  %v727_v63 = vadd.f32 %v2716_v37, %v662_v23  ;;  %v728_v7 = vadd.f32 %v2716_v37, %v667_v32  ;;  %v729_v14 = vadd.f32 %v2716_v37, %v2706_v28  ;;  %v697_v23 = vpop.permute.xlu1 %696 }
 0x1cf   : > { %vm746_vm2 = vcmp.gt.f32.partialorder %v730_v39, 0.0  ;;  %v762_v45 = vmul.f32 0.2, %v730_v39  ;;  %vm739_vm3 = vcmp.gt.f32.partialorder %v723_v40, 0.0  ;;  %v755_v46 = vmul.f32 0.2, %v723_v40 }
 0x1d0   : > { %vm740_vm4 = vcmp.gt.f32.partialorder %v724_v41, 0.0  ;;  %v756_v47 = vmul.f32 0.2, %v724_v41  ;;  %v757_v56 = vmul.f32 0.2, %v725_v44  ;;  %vm741_vm6 = vcmp.gt.f32.partialorder %v725_v44, 0.0 }
 0x1d1   : > { %v778_v48 = vsel %vm746_vm2, %v730_v39, %v762_v45  ;;  %v771_v49 = vsel %vm739_vm3, %v723_v40, %v755_v46  ;;  %v758_v62 = vmul.f32 0.2, %v726_v57  ;;  %vm742_vm8 = vcmp.gt.f32.partialorder %v726_v57, 0.0 }
 0x1d2   : > { %v2728_v51 = vsel %vm794_vm0, %v778_v48, -1e+30  ;;  %v2732_v52 = vsel %vm787_vm1, %v771_v49, -1e+30  ;;  %v772_v55 = vsel %vm740_vm4, %v724_v41, %v756_v47  ;;  %v773_v61 = vsel %vm741_vm6, %v725_v44, %v757_v56  ;;  %v702_v32 = vpop.permute.xlu1 %701  ;;  %v340_v49 = vld [vmem:[%s2697_s12 + $0x18] sm:$0xff] }
 0x1d3   : > { %833 = vmax.xlane.f32.xlu0 %v2728_v51  ;;  %819 = vmax.xlane.f32.xlu1 %v2732_v52  ;;  %v2742_v58 = vsel %vm788_vm5, %v772_v55, -1e+30  ;;  %v2752_v2 = vsel %vm789_vm7, %v773_v61, -1e+30  ;;  %v774_v5 = vsel %vm742_vm8, %v726_v57, %v758_v62  ;;  %v759_v6 = vmul.f32 0.2, %v727_v63 }
 0x1d4   : > { %vm743_vm10 = vcmp.gt.f32.partialorder %v727_v63, 0.0  ;;  %v2762_v9 = vsel %vm790_vm9, %v774_v5, -1e+30  ;;  %v760_v13 = vmul.f32 0.2, %v728_v7  ;;  %vm744_vm12 = vcmp.gt.f32.partialorder %v728_v7, 0.0 }
 0x1d5   : > { %v775_v12 = vsel %vm743_vm10, %v727_v63, %v759_v6  ;;  %v761_v20 = vmul.f32 0.2, %v729_v14  ;;  %v731_v21 = vadd.f32 %v2716_v37, %v682_v50  ;;  %vm745_vm14 = vcmp.gt.f32.partialorder %v729_v14, 0.0 }
 0x1d6   : > { %v2774_v16 = vsel %vm791_vm11, %v775_v12, -1e+30  ;;  %v776_v19 = vsel %vm744_vm12, %v728_v7, %v760_v13  ;;  %v350_v27 = vunpack.c.1.s8 %v339_v15  ;;  %v732_v30 = vadd.f32 %v2716_v37, %v687_v1  ;;  %v707_v50 = vpop.permute.xlu1 %706 }
 0x1d7   : > { %821 = vmax.xlane.f32.xlu1 %v2742_v58  ;;  %v2783_v25 = vsel %vm792_vm13, %v776_v19, -1e+30  ;;  %v777_v28 = vsel %vm745_vm14, %v729_v14, %v761_v20  ;;  %v763_v29 = vmul.f32 0.2, %v731_v21  ;;  %vm747_vm2 = vcmp.gt.f32.partialorder %v731_v21, 0.0 }
 0x1d8   : > { %v2792_v33 = vsel %vm793_vm15, %v777_v28, -1e+30  ;;  %v2794_v36 = vcvt.s32.f32 %v350_v27  ;;  %v351_v38 = vunpack.c.2.s8 %v339_v15  ;;  %vm795_vm3 = vcmp.gt.f32.partialorder %v2785_v26, 0.0 }
 0x1d9   : > { %v779_v39 = vsel %vm747_vm2, %v731_v21, %v763_v29  ;;  %v764_v40 = vmul.f32 0.2, %v732_v30  ;;  %v733_v41 = vadd.f32 %v2716_v37, %v692_v8  ;;  %vm748_vm4 = vcmp.gt.f32.partialorder %v732_v30, 0.0 }
 0x1da   : > { %v2801_v42 = vsel %vm795_vm3, %v779_v39, -1e+30  ;;  %v2803_v44 = vcvt.s32.f32 %v351_v38  ;;  %v352_v45 = vunpack.c.3.s8 %v339_v15  ;;  %vm796_vm6 = vcmp.gt.f32.partialorder %v2794_v36, 0.0  ;;  %v712_v62 = vpop.permute.xlu1 %711 }
 0x1db   : > { %823 = vmax.xlane.f32.xlu1 %v2752_v2  ;;  %v780_v46 = vsel %vm748_vm4, %v732_v30, %v764_v40  ;;  %v765_v47 = vmul.f32 0.2, %v733_v41  ;;  %v734_v48 = vadd.f32 %v2716_v37, %v697_v23  ;;  %vm749_vm8 = vcmp.gt.f32.partialorder %v733_v41, 0.0 }
 0x1dc   : > { %v2811_v54 = vsel %vm796_vm6, %v780_v46, -1e+30  ;;  %v2813_v55 = vcvt.s32.f32 %v352_v45  ;;  %v353_v56 = vunpack.c.0.s8 %v340_v49  ;;  %vm797_vm10 = vcmp.gt.f32.partialorder %v2803_v44, 0.0 }
 0x1dd   : > { %v781_v57 = vsel %vm749_vm8, %v733_v41, %v765_v47  ;;  %v766_v60 = vmul.f32 0.2, %v734_v48  ;;  %v735_v61 = vadd.f32 %v2716_v37, %v702_v32  ;;  %vm750_vm12 = vcmp.gt.f32.partialorder %v734_v48, 0.0 }
 0x1de   : > { %v2820_v63 = vsel %vm797_vm10, %v781_v57, -1e+30  ;;  %v2822_v1 = vcvt.s32.f32 %v353_v56  ;;  %v354_v4 = vunpack.c.1.s8 %v340_v49  ;;  %vm3284_vm14 = vcmp.gt.f32.partialorder %v2813_v55, 0.0  ;;  %v717_v18 = vpop.permute.xlu1 %716 }
 0x1df   : > { %825 = vmax.xlane.f32.xlu1 %v2762_v9  ;;  %v782_v5 = vsel %vm750_vm12, %v734_v48, %v766_v60  ;;  %v767_v6 = vmul.f32 0.2, %v735_v61  ;;  %v736_v7 = vadd.f32 %v2716_v37, %v707_v50  ;;  %vm751_vm2 = vcmp.gt.f32.partialorder %v735_v61, 0.0 }
 0x1e0   : > { %v2829_v8 = vsel %vm3284_vm14, %v782_v5, -1e+30  ;;  %v2831_v11 = vcvt.s32.f32 %v354_v4  ;;  %v355_v12 = vunpack.c.2.s8 %v340_v49  ;;  %v737_v13 = vadd.f32 %v2716_v37, %v712_v62 }
 0x1e1   : > { %v783_v14 = vsel %vm751_vm2, %v735_v61, %v767_v6  ;;  %vm3283_vm4 = vcmp.gt.f32.partialorder %v2822_v1, 0.0  ;;  %v768_v15 = vmul.f32 0.2, %v736_v7  ;;  %vm752_vm8 = vcmp.gt.f32.partialorder %v736_v7, 0.0 }
 0x1e2   : > { %v2838_v19 = vsel %vm3283_vm4, %v783_v14, -1e+30  ;;  %vm3286_vm12 = vcmp.gt.f32.partialorder %v2831_v11, 0.0  ;;  %v2841_v20 = vcvt.s32.f32 %v355_v12  ;;  %v738_v21 = vadd.f32 %v2716_v37, %v717_v18 }
 0x1e3   : > { %827 = vmax.xlane.f32.xlu1 %v2774_v16  ;;  %v784_v23 = vsel %vm752_vm8, %v736_v7, %v768_v15  ;;  %v769_v27 = vmul.f32 0.2, %v737_v13  ;;  %v356_v28 = vunpack.c.3.s8 %v340_v49  ;;  %vm753_vm2 = vcmp.gt.f32.partialorder %v737_v13, 0.0 }
 0x1e4   : > { %v2847_v29 = vsel %vm3286_vm12, %v784_v23, -1e+30  ;;  %vm3285_vm4 = vcmp.gt.f32.partialorder %v2841_v20, 0.0  ;;  %v770_v38 = vmul.f32 0.2, %v738_v21  ;;  %vm754_vm14 = vcmp.gt.f32.partialorder %v738_v21, 0.0 }
 0x1e5   : > { %v785_v30 = vsel %vm753_vm2, %v737_v13, %v769_v27  ;;  %v2851_v32 = vcvt.s32.f32 %v356_v28 }
 0x1e6   : > { %v2855_v37 = vsel %vm3285_vm4, %v785_v30, -1e+30  ;;  %v786_v39 = vsel %vm754_vm14, %v738_v21, %v770_v38 }
 0x1e7   : > { %829 = vmax.xlane.f32.xlu1 %v2783_v25  ;;  %vm802_vm8 = vcmp.gt.f32.partialorder %v2851_v32, 0.0 }
 0x1e8   : > { %v2861_v40 = vsel %vm802_vm8, %v786_v39, -1e+30 }
 0x1eb   : > { %831 = vmax.xlane.f32.xlu1 %v2792_v33 }
 0x1ef   : > { %835 = vmax.xlane.f32.xlu1 %v2801_v42 }
 0x1f3   : > { %837 = vmax.xlane.f32.xlu1 %v2811_v54 }
 0x1f7   : > { %839 = vmax.xlane.f32.xlu1 %v2820_v63 }
 0x1fb   : > { %841 = vmax.xlane.f32.xlu1 %v2829_v8 }
 0x1ff   : > { %843 = vmax.xlane.f32.xlu1 %v2838_v19 }
 0x203   : > { %845 = vmax.xlane.f32.xlu1 %v2847_v29 }
 0x207   : > { %847 = vmax.xlane.f32.xlu1 %v2855_v37 }
 0x20b   : > { %849 = vmax.xlane.f32.xlu1 %v2861_v40 }
 0x25c   : > { %v820_v41 = vpop.xlane.xlu1 %819  ;;  %v834_v5 = vpop.xlane.xlu0 %833 }
 0x25d   : > { %v851_v45 = vsub.f32 %v2732_v52, %v820_v41  ;;  %v858_v7 = vsub.f32 %v2728_v51, %v834_v5 }
 0x25f   : > { %v867_v46 = vmul.f32 1.442695, %v851_v45  ;;  %v881_v14 = vmul.f32 1.442695, %v858_v7 }
 0x260   : > { %v822_v47 = vpop.xlane.xlu1 %821 }
 0x261   : > { %v852_v48 = vsub.f32 %v2742_v58, %v822_v47  ;;  %2226 = vpow2.f32 %v867_v46 }
 0x263   : > { %v869_v49 = vmul.f32 1.442695, %v852_v48 }
 0x264   : > { %v824_v50 = vpop.xlane.xlu1 %823 }
 0x265   : > { %2228 = vpow2.f32 %v869_v49  ;;  %v853_v56 = vsub.f32 %v2752_v2, %v824_v50 }
 0x267   : > { %v871_v57 = vmul.f32 1.442695, %v853_v56 }
 0x268   : > { %v826_v60 = vpop.xlane.xlu1 %825 }
 0x269   : > { %2230 = vpow2.f32 %v871_v57  ;;  %v854_v61 = vsub.f32 %v2762_v9, %v826_v60 }
 0x26b   : > { %v873_v62 = vmul.f32 1.442695, %v854_v61 }
 0x26c   : > { %v828_v4 = vpop.xlane.xlu1 %827 }
 0x26d   : > { %2232 = vpow2.f32 %v873_v62  ;;  %v855_v52 = vsub.f32 %v2774_v16, %v828_v4 }
 0x26e   : > { %v2869_v6 = vpop.eup %2226 }
 0x26f   : > { %v875_v58 = vmul.f32 1.442695, %v855_v52  ;;  %899 = vadd.xlane.f32.xlu1 %v2869_v6 }
 0x270   : > { %v830_v12 = vpop.xlane.xlu1 %829 }
 0x271   : > { %2234 = vpow2.f32 %v875_v58  ;;  %v856_v2 = vsub.f32 %v2783_v25, %v830_v12 }
 0x272   : > { %v2874_v13 = vpop.eup %2228 }
 0x273   : > { %v877_v9 = vmul.f32 1.442695, %v856_v2  ;;  %901 = vadd.xlane.f32.xlu1 %v2874_v13 }
 0x274   : > { %v832_v15 = vpop.xlane.xlu1 %831 }
 0x275   : > { %2236 = vpow2.f32 %v877_v9  ;;  %v857_v16 = vsub.f32 %v2792_v33, %v832_v15 }
 0x276   : > { %v2878_v18 = vpop.eup %2230  ;;  %2238 = vpow2.f32 %v881_v14 }
 0x277   : > { %v879_v21 = vmul.f32 1.442695, %v857_v16  ;;  %903 = vadd.xlane.f32.xlu1 %v2878_v18 }
 0x278   : > { %v836_v51 = vpop.xlane.xlu1 %835 }
 0x279   : > { %2240 = vpow2.f32 %v879_v21  ;;  %v859_v25 = vsub.f32 %v2801_v42, %v836_v51 }
 0x27a   : > { %v2882_v23 = vpop.eup %2232 }
 0x27b   : > { %v883_v27 = vmul.f32 1.442695, %v859_v25  ;;  %905 = vadd.xlane.f32.xlu0 %v2882_v23 }
 0x27c   : > { %v838_v28 = vpop.xlane.xlu1 %837 }
 0x27d   : > { %2242 = vpow2.f32 %v883_v27  ;;  %v860_v30 = vsub.f32 %v2811_v54, %v838_v28 }
 0x27e   : > { %v2886_v33 = vpop.eup %2234 }
 0x27f   : > { %v885_v38 = vmul.f32 1.442695, %v860_v30  ;;  %907 = vadd.xlane.f32.xlu1 %v2886_v33 }
 0x280   : > { %v840_v39 = vpop.xlane.xlu1 %839 }
 0x281   : > { %2244 = vpow2.f32 %v885_v38  ;;  %v861_v41 = vsub.f32 %v2820_v63, %v840_v39 }
 0x282   : > { %v2890_v45 = vpop.eup %2236 }
 0x283   : > { %v887_v42 = vmul.f32 1.442695, %v861_v41  ;;  %909 = vadd.xlane.f32.xlu0 %v2890_v45  ;;  %v2893_v47 = vpop.eup %2238 }
 0x284   : > { %v842_v46 = vpop.xlane.xlu1 %841 }
 0x285   : > { %2246 = vpow2.f32 %v887_v42  ;;  %v862_v54 = vsub.f32 %v2829_v8, %v842_v46 }
 0x286   : > { %v2896_v48 = vpop.eup %2240 }
 0x287   : > { %v889_v49 = vmul.f32 1.442695, %v862_v54  ;;  %913 = vadd.xlane.f32.xlu0 %v2893_v47  ;;  %911 = vadd.xlane.f32.xlu1 %v2896_v48 }
 0x288   : > { %v844_v50 = vpop.xlane.xlu1 %843 }
 0x289   : > { %2248 = vpow2.f32 %v889_v49  ;;  %v863_v63 = vsub.f32 %v2838_v19, %v844_v50 }
 0x28a   : > { %v2901_v56 = vpop.eup %2242 }
 0x28b   : > { %v891_v57 = vmul.f32 1.442695, %v863_v63  ;;  %915 = vadd.xlane.f32.xlu1 %v2901_v56 }
 0x28c   : > { %v846_v60 = vpop.xlane.xlu1 %845 }
 0x28d   : > { %2250 = vpow2.f32 %v891_v57  ;;  %v864_v8 = vsub.f32 %v2847_v29, %v846_v60 }
 0x28e   : > { %v2905_v61 = vpop.eup %2244 }
 0x28f   : > { %v893_v62 = vmul.f32 1.442695, %v864_v8  ;;  %917 = vadd.xlane.f32.xlu0 %v2905_v61 }
 0x290   : > { %v848_v4 = vpop.xlane.xlu1 %847 }
 0x291   : > { %2252 = vpow2.f32 %v893_v62  ;;  %v865_v5 = vsub.f32 %v2855_v37, %v848_v4 }
 0x292   : > { %v2909_v52 = vpop.eup %2246 }
 0x293   : > { %v895_v19 = vmul.f32 1.442695, %v865_v5  ;;  %919 = vadd.xlane.f32.xlu1 %v2909_v52 }
 0x294   : > { %v850_v58 = vpop.xlane.xlu1 %849 }
 0x295   : > { %2254 = vpow2.f32 %v895_v19  ;;  %v866_v7 = vsub.f32 %v2861_v40, %v850_v58  ;;  %v2204_v40 = vld [vmem:[%s3278_s5 + $0x74] ss:$8 sps:$4 sm:$0xff]  }
 0x296   : > { %v2913_v12 = vpop.eup %2248  ;;  %1203 = vmatprep.subr.bf16.mxu1 %v2204_v40  ;;  %v2213_v40 = vld [vmem:[%s3278_s5 + $0x44] ss:$8 sps:$4 sm:$0xff]  }
 0x297   : > { %v897_v29 = vmul.f32 1.442695, %v866_v7  ;;  %921 = vadd.xlane.f32.xlu0 %v2913_v12  ;;  %v2208_v7 = vld [vmem:[%s3278_s5 + $0x50] ss:$8 sps:$4 sm:$0xff]  }
 0x299   : > { %2256 = vpow2.f32 %v897_v29 }
 0x29a   : > { %v2916_v2 = vpop.eup %2250 }
 0x29b   : > { %923 = vadd.xlane.f32.xlu1 %v2916_v2 }
 0x29e   : > { %v2919_v37 = vpop.eup %2252 }
 0x29f   : > { %925 = vadd.xlane.f32.xlu0 %v2919_v37 }
 0x2a2   : > { %v2922_v9 = vpop.eup %2254 }
 0x2a3   : > { %927 = vadd.xlane.f32.xlu1 %v2922_v9 }
 0x2a6   : > { %v2925_v14 = vpop.eup %2256 }
 0x2a7   : > { %929 = vadd.xlane.f32.xlu0 %v2925_v14 }
 0x2f8   : > { %v900_v15 = vpop.xlane.xlu1 %899 }
 0x2f9   : > { %2258 = vrcp.f32 %v900_v15 }
 0x2fc   : > { %v902_v16 = vpop.xlane.xlu1 %901 }
 0x2fd   : > { %2260 = vrcp.f32 %v902_v16 }
 0x300   : > { %v904_v21 = vpop.xlane.xlu1 %903 }
 0x301   : > { %2262 = vrcp.f32 %v904_v21 }
 0x304   : > { %v906_v51 = vpop.xlane.xlu0 %905 }
 0x305   : > { %2264 = vrcp.f32 %v906_v51  ;;  %v2211_v51 = vld [vmem:[%s3278_s5 + $0x40] ss:$8 sps:$4 sm:$0xff]  }
 0x306   : > { %v2259_v27 = vpop.eup %2258 }
 0x307   : > { %v947_v38 = vmul.f32 %v2259_v27, %v2869_v6  ;;  %v2202_v6 = vld [vmem:[%s3278_s5 + $0x70] ss:$8 sps:$4 sm:$0xff]   ;;  %v2216_v27 = vld [vmem:[%s3278_s5 + $0x34] ss:$8 sps:$4 sm:$0xff]  }
 0x308   : > { %v908_v25 = vpop.xlane.xlu1 %907 }
 0x309   : > { %2266 = vrcp.f32 %v908_v25 }
 0x30a   : > { %v2261_v28 = vpop.eup %2260 }
 0x30b   : > { %v948_v39 = vmul.f32 %v2261_v28, %v2874_v13  ;;  %v2207_v13 = vld [vmem:[%s3278_s5 + $0x64] ss:$8 sps:$4 sm:$0xff]  }
 0x30c   : > { %v910_v30 = vpop.xlane.xlu0 %909 }
 0x30d   : > { %2268 = vrcp.f32 %v910_v30  ;;  %v963_v41 = vpack.c.bf16 %v948_v39, %v947_v38 }
 0x30e   : > { %v2263_v42 = vpop.eup %2262 }
 0x30f   : > { %2058 = vmatprep.mubr.bf16.mxu1 %v963_v41  ;;  %v949_v50 = vmul.f32 %v2263_v42, %v2878_v18  ;;  %v2205_v18 = vld [vmem:[%s3278_s5 + $0x60] ss:$8 sps:$4 sm:$0xff]  }
 0x310   : > { %v914_v46 = vpop.xlane.xlu0 %913  ;;  %v912_v54 = vpop.xlane.xlu1 %911 }
 0x311   : > { %2270 = vrcp.f32 %v914_v46 }
 0x312   : > { %v2265_v49 = vpop.eup %2264  ;;  %2272 = vrcp.f32 %v912_v54 }
 0x313   : > { %v950_v63 = vmul.f32 %v2265_v49, %v2882_v23  ;;  %v2210_v23 = vld [vmem:[%s3278_s5 + $0x54] ss:$8 sps:$4 sm:$0xff]  }
 0x314   : > { %v916_v57 = vpop.xlane.xlu1 %915 }
 0x315   : > { %v964_v60 = vpack.c.bf16 %v950_v63, %v949_v50  ;;  %2274 = vrcp.f32 %v916_v57 }
 0x316   : > { %v2267_v8 = vpop.eup %2266 }
 0x317   : > { %2059 = vmatmul.mubr.bf16.vlgmr.msra.gmra.mxu1 %v964_v60  ;;  %v951_v5 = vmul.f32 %v2267_v8, %v2886_v33 }
 0x318   : > { %v918_v62 = vpop.xlane.xlu0 %917  ;;  %1204 = vmatpush1.bf16.msra.mxu1 %v2202_v6 }
 0x319   : > { %2276 = vrcp.f32 %v918_v62  ;;  %1205 = vmatprep.subr.bf16.mxu1 %v2207_v13 }
 0x31a   : > { %v2269_v4 = vpop.eup %2268 }
 0x31b   : > { %v952_v19 = vmul.f32 %v2269_v4, %v2890_v45 }
 0x31c   : > { %v920_v58 = vpop.xlane.xlu1 %919  ;;  %1206 = vmatpush1.bf16.msra.mxu1 %v2205_v18 }
 0x31d   : > { %v965_v29 = vpack.c.bf16 %v952_v19, %v951_v5  ;;  %1207 = vmatprep.subr.bf16.mxu1 %v2210_v23  ;;  %2278 = vrcp.f32 %v920_v58  ;;  %v2223_v5 = vld [vmem:[%s3278_s5] ss:$8 sps:$4 sm:$0xff]  }
 0x31e   : > { %v2271_v15 = vpop.eup %2270 }
 0x31f   : > { %v2273_v16 = vpop.eup %2272  ;;  %2062 = vmatprep.mubr.bf16.mxu1 %v965_v29  ;;  %v954_v33 = vmul.f32 %v2271_v15, %v2893_v47  ;;  %v2214_v47 = vld [vmem:[%s3278_s5 + $0x30] ss:$8 sps:$4 sm:$0xff]  }
 0x320   : > { %v922_v21 = vpop.xlane.xlu0 %921  ;;  %v953_v45 = vmul.f32 %v2273_v16, %v2896_v48  ;;  %1208 = vmatpush1.bf16.msra.mxu1 %v2208_v7  ;;  %v2996_v7 = vld [vmem:[%s3277_s4] ss:$0 sm:$0xff] }
 0x321   : > { %2280 = vrcp.f32 %v922_v21  ;;  %1209 = vmatprep.subr.bf16.mxu1 %v2213_v40 }
 0x322   : > { %v966_v25 = vpack.c.bf16 %v954_v33, %v953_v45  ;;  %v2275_v28 = vpop.eup %2274 }
 0x323   : > { %v955_v38 = vmul.f32 %v2275_v28, %v2901_v56 }
 0x324   : > { %2063 = vmatmul.mubr.bf16.gmra.mxu1 %v966_v25  ;;  %v924_v30 = vpop.xlane.xlu1 %923 }
 0x325   : > { %1210 = vmatpush1.bf16.msra.mxu1 %v2211_v51  ;;  %2282 = vrcp.f32 %v924_v30 }
 0x326   : > { %v2277_v48 = vpop.eup %2276  ;;  %1211 = vmatprep.subr.bf16.mxu1 %v2216_v27 }
 0x327   : > { %v956_v39 = vmul.f32 %v2277_v48, %v2905_v61 }
 0x328   : > { %v926_v41 = vpop.xlane.xlu0 %925 }
 0x329   : > { %2284 = vrcp.f32 %v926_v41  ;;  %v967_v42 = vpack.c.bf16 %v956_v39, %v955_v38  ;;  %1212 = vmatpush1.bf16.msra.mxu1 %v2214_v47 }
 0x32a   : > { %v2279_v46 = vpop.eup %2278 }
 0x32b   : > { %2066 = vmatprep.mubr.bf16.mxu1 %v967_v42  ;;  %v957_v50 = vmul.f32 %v2279_v46, %v2909_v52 }
 0x32c   : > { %v928_v54 = vpop.xlane.xlu1 %927 }
 0x32d   : > { %2286 = vrcp.f32 %v928_v54 }
 0x32e   : > { %v2281_v49 = vpop.eup %2280 }
 0x32f   : > { %v958_v63 = vmul.f32 %v2281_v49, %v2913_v12  ;;  %v2217_v12 = vld [vmem:[%s3278_s5 + $0x20] ss:$8 sps:$4 sm:$0xff]  }
 0x330   : > { %v930_v57 = vpop.xlane.xlu0 %929 }
 0x331   : > { %2288 = vrcp.f32 %v930_v57  ;;  %v968_v6 = vpack.c.bf16 %v958_v63, %v957_v50 }
 0x332   : > { %v2283_v56 = vpop.eup %2282 }
 0x333   : > { %2067 = vmatmul.mubr.bf16.gmra.mxu1 %v968_v6  ;;  %v959_v61 = vmul.f32 %v2283_v56, %v2916_v2  ;;  %v2219_v2 = vld [vmem:[%s3278_s5 + $0x24] ss:$8 sps:$4 sm:$0xff]  }
 0x334   : > { %1213 = vmatprep.subr.bf16.mxu1 %v2219_v2 }
 0x335   : > { %1214 = vmatpush1.bf16.msra.mxu1 %v2217_v12 }
 0x336   : > { %v2285_v60 = vpop.eup %2284 }
 0x337   : > { %v960_v13 = vmul.f32 %v2285_v60, %v2919_v37  ;;  %v2220_v37 = vld [vmem:[%s3278_s5 + $0x10] ss:$8 sps:$4 sm:$0xff]  }
 0x339   : > { %v969_v8 = vpack.c.bf16 %v960_v13, %v959_v61 }
 0x33a   : > { %v2287_v62 = vpop.eup %2286 }
 0x33b   : > { %2070 = vmatprep.mubr.bf16.mxu1 %v969_v8  ;;  %v961_v23 = vmul.f32 %v2287_v62, %v2922_v9  ;;  %v2222_v9 = vld [vmem:[%s3278_s5 + $0x14] ss:$8 sps:$4 sm:$0xff]  }
 0x33c   : > { %1215 = vmatprep.subr.bf16.mxu1 %v2222_v9 }
 0x33d   : > { %1216 = vmatpush1.bf16.msra.mxu1 %v2220_v37 }
 0x33e   : > { %v2289_v18 = vpop.eup %2288 }
 0x33f   : > { %v962_v52 = vmul.f32 %v2289_v18, %v2925_v14  ;;  %v2225_v14 = vld [vmem:[%s3278_s5 + $0x4] ss:$8 sps:$4 sm:$0xff]  }
 0x340   : > { %1217 = vmatprep.subr.bf16.mxu1 %v2225_v14 }
 0x341   : > { %v970_v4 = vpack.c.bf16 %v962_v52, %v961_v23  ;;  %1218 = vmatpush1.bf16.msra.mxu1 %v2223_v5 }
 0x343   : > { %2071 = vmatmul.mubr.bf16.gmra.mxu1 %v970_v4 }
 0x344   : > { %1235 = vmatprep.mubr.bf16.mxu1 %v2453_v0 }
 0x3d7   : > { %v2060_v19 = vpop.f32.mrf.mxu1 }
 0x3d8   : > { %v1028_v25 = vadd.f32 %v2060_v19, %v2996_v7 }
 0x3d9   : > { %v1019_v58 = vpop.f32.mrf.mxu1 }
 0x3da   : > { %v1020_v40 = vadd.f32 %v2996_v7, %v1019_v58  ;;  %v1084_v47 = vmax.f32 %v1028_v25, 0.0 }
 0x3db   : > { %v2061_v29 = vpop.f32.mrf.mxu1 }
 0x3dc   : > { %v1082_v33 = vmax.f32 %v1020_v40, 0.0  ;;  %v1031_v45 = vadd.f32 %v2061_v29, %v2996_v7 }
 0x3dd   : > { %v1022_v15 = vpop.f32.mrf.mxu1 }
 0x3de   : > { %v1023_v16 = vadd.f32 %v2996_v7, %v1022_v15  ;;  %v1085_v28 = vmax.f32 %v1031_v45, 0.0 }
 0x3e0   : > { %v1083_v21 = vmax.f32 %v1023_v16, 0.0  ;;  %v1099_v38 = vpack.c.bf16 %v1085_v28, %v1084_v47 }
 0x3e2   : > { %v1098_v51 = vpack.c.bf16 %v1083_v21, %v1082_v33 }
 0x3e4   : > { %v2064_v27 = vpop.f32.mrf.mxu1  ;;  %1236 = vmatmul.mubr.bf16.vlgmr.msra.gmra.mxu1 %v1098_v51 }
 0x3e5   : > { %1245 = vmatprep.mubr.bf16.mxu1 %v2453_v0  ;;  %v1044_v57 = vadd.f32 %v2064_v27, %v2996_v7 }
 0x3e6   : > { %v1035_v30 = vpop.f32.mrf.mxu1 }
 0x3e7   : > { %v1036_v42 = vadd.f32 %v2996_v7, %v1035_v30  ;;  %v1088_v61 = vmax.f32 %v1044_v57, 0.0 }
 0x3e8   : > { %v2065_v48 = vpop.f32.mrf.mxu1 }
 0x3e9   : > { %v1086_v54 = vmax.f32 %v1036_v42, 0.0  ;;  %v1047_v49 = vadd.f32 %v2065_v48, %v2996_v7 }
 0x3ea   : > { %v1038_v39 = vpop.f32.mrf.mxu1 }
 0x3eb   : > { %v1039_v41 = vadd.f32 %v2996_v7, %v1038_v39  ;;  %v1089_v56 = vmax.f32 %v1047_v49, 0.0 }
 0x3ec   : > { %1246 = vmatmul.mubr.bf16.gmra.mxu1 %v1099_v38 }
 0x3ed   : > { %1255 = vmatprep.mubr.bf16.mxu1 %v2453_v0  ;;  %v1087_v46 = vmax.f32 %v1039_v41, 0.0  ;;  %v1101_v8 = vpack.c.bf16 %v1089_v56, %v1088_v61 }
 0x3ef   : > { %v1100_v50 = vpack.c.bf16 %v1087_v46, %v1086_v54 }
 0x3f3   : > { %v2068_v63 = vpop.f32.mrf.mxu1 }
 0x3f4   : > { %1256 = vmatmul.mubr.bf16.gmra.mxu1 %v1100_v50  ;;  %v1060_v37 = vadd.f32 %v2068_v63, %v2996_v7 }
 0x3f5   : > { %v1051_v6 = vpop.f32.mrf.mxu1  ;;  %1265 = vmatprep.mubr.bf16.mxu1 %v2453_v0 }
 0x3f6   : > { %v1052_v18 = vadd.f32 %v2996_v7, %v1051_v6  ;;  %v1092_v19 = vmax.f32 %v1060_v37, 0.0 }
 0x3f7   : > { %v2069_v60 = vpop.f32.mrf.mxu1 }
 0x3f8   : > { %v1090_v52 = vmax.f32 %v1052_v18, 0.0  ;;  %v1063_v4 = vadd.f32 %v2069_v60, %v2996_v7 }
 0x3f9   : > { %v1054_v13 = vpop.f32.mrf.mxu1 }
 0x3fa   : > { %v1055_v62 = vadd.f32 %v2996_v7, %v1054_v13  ;;  %v1093_v14 = vmax.f32 %v1063_v4, 0.0 }
 0x3fc   : > { %1266 = vmatmul.mubr.bf16.gmra.mxu1 %v1101_v8  ;;  %v1091_v23 = vmax.f32 %v1055_v62, 0.0  ;;  %v1103_v29 = vpack.c.bf16 %v1093_v14, %v1092_v19 }
 0x3fd   : > { %1275 = vmatprep.mubr.bf16.mxu1 %v2453_v0 }
 0x3fe   : > { %v1102_v12 = vpack.c.bf16 %v1091_v23, %v1090_v52 }
 0x403   : > { %v2072_v2 = vpop.f32.mrf.mxu1 }
 0x404   : > { %1276 = vmatmul.mubr.bf16.gmra.mxu1 %v1102_v12  ;;  %v1076_v51 = vadd.f32 %v2072_v2, %v2996_v7 }
 0x405   : > { %v1067_v9 = vpop.f32.mrf.mxu1  ;;  %1285 = vmatprep.mubr.bf16.mxu1 %v2453_v0 }
 0x406   : > { %v1068_v15 = vadd.f32 %v2996_v7, %v1067_v9  ;;  %v1096_v27 = vmax.f32 %v1076_v51, 0.0 }
 0x407   : > { %v2073_v5 = vpop.f32.mrf.mxu1 }
 0x408   : > { %v1094_v33 = vmax.f32 %v1068_v15, 0.0  ;;  %v1079_v21 = vadd.f32 %v2073_v5, %v2996_v7 }
 0x409   : > { %v1070_v58 = vpop.f32.mrf.mxu1 }
 0x40a   : > { %v1071_v40 = vadd.f32 %v2996_v7, %v1070_v58  ;;  %v1097_v25 = vmax.f32 %v1079_v21, 0.0 }
 0x40c   : > { %1286 = vmatmul.mubr.bf16.gmra.mxu1 %v1103_v29  ;;  %v1095_v16 = vmax.f32 %v1071_v40, 0.0  ;;  %v1105_v28 = vpack.c.bf16 %v1097_v25, %v1096_v27 }
 0x40d   : > { %1295 = vmatprep.mubr.bf16.mxu1 %v2453_v0 }
 0x40e   : > { %v1104_v45 = vpack.c.bf16 %v1095_v16, %v1094_v33 }
 0x414   : > { %1296 = vmatmul.mubr.bf16.gmra.mxu1 %v1104_v45 }
 0x415   : > { %1305 = vmatprep.mubr.bf16.mxu1 %v2453_v0 }
 0x41c   : > { %1306 = vmatmul.mubr.bf16.gmra.mxu1 %v1105_v28 }
 0x4a4   : > { %v1237_v30 = vpop.f32.mrf.mxu1 }
 0x4a6   : > { %v3021_v47 = vpop.f32.mrf.mxu1 }
 0x4a7   : > { %1350 = vperm.xlu1 %2177, %v3021_v47  }
 0x4a8   : > { %v1241_v48 = vpop.f32.mrf.mxu1 }
 0x4a9   : > { %v3024_v38 = vpack.c.bf16 %v1241_v48, %v1237_v30 }
 0x4aa   : > { %v3026_v39 = vpop.f32.mrf.mxu1 }
 0x4ab   : > { %1355 = vperm.xlu0 %2176, %v3026_v39  }
 0x4ac   : > { %v1247_v7 = vpop.f32.mrf.mxu1 }
 0x4ae   : > { %v3029_v41 = vpop.f32.mrf.mxu1 }
 0x4af   : > { %1360 = vperm.xlu1 %2177, %v3029_v41  }
 0x4b0   : > { %v1251_v0 = vpop.f32.mrf.mxu1 }
 0x4b1   : > { %v1665_v42 = vpack.c.bf16 %v1251_v0, %v1247_v7 }
 0x4b2   : > { %v1253_v46 = vpop.f32.mrf.mxu1 }
 0x4b3   : > { %1365 = vperm.xlu1 %2177, %v1253_v46  }
 0x4b4   : > { %v1257_v54 = vpop.f32.mrf.mxu1 }
 0x4b6   : > { %v1259_v49 = vpop.f32.mrf.mxu1 }
 0x4b7   : > { %1370 = vperm.xlu0 %2176, %v1259_v49  }
 0x4b8   : > { %v1261_v50 = vpop.f32.mrf.mxu1 }
 0x4b9   : > { %v1666_v21 = vpack.c.bf16 %v1261_v50, %v1257_v54 }
 0x4ba   : > { %v1263_v63 = vpop.f32.mrf.mxu1 }
 0x4bb   : > { %1375 = vperm.xlu1 %2177, %v1263_v63  }
 0x4bc   : > { %v1267_v57 = vpop.f32.mrf.mxu1 }
 0x4be   : > { %v1269_v6 = vpop.f32.mrf.mxu1 }
 0x4bf   : > { %1380 = vperm.xlu0 %2176, %v1269_v6  }
 0x4c0   : > { %v1271_v56 = vpop.f32.mrf.mxu1 }
 0x4c1   : > { %v1667_v33 = vpack.c.bf16 %v1271_v56, %v1267_v57 }
 0x4c2   : > { %v1273_v60 = vpop.f32.mrf.mxu1 }
 0x4c3   : > { %1385 = vperm.xlu1 %2177, %v1273_v60  }
 0x4c4   : > { %v1277_v61 = vpop.f32.mrf.mxu1 }
 0x4c6   : > { %v1279_v13 = vpop.f32.mrf.mxu1 }
 0x4c7   : > { %1390 = vperm.xlu0 %2176, %v1279_v13  }
 0x4c8   : > { %v1281_v8 = vpop.f32.mrf.mxu1 }
 0x4c9   : > { %v1668_v16 = vpack.c.bf16 %v1281_v8, %v1277_v61 }
 0x4ca   : > { %v1283_v62 = vpop.f32.mrf.mxu1 }
 0x4cb   : > { %1395 = vperm.xlu1 %2177, %v1283_v62  }
 0x4cc   : > { %v1287_v18 = vpop.f32.mrf.mxu1 }
 0x4ce   : > { %v1289_v23 = vpop.f32.mrf.mxu1 }
 0x4cf   : > { %1400 = vperm.xlu0 %2176, %v1289_v23  }
 0x4d0   : > { %v1291_v52 = vpop.f32.mrf.mxu1 }
 0x4d1   : > { %v1669_v15 = vpack.c.bf16 %v1291_v52, %v1287_v18 }
 0x4d2   : > { %v1293_v4 = vpop.f32.mrf.mxu1 }
 0x4d3   : > { %1405 = vperm.xlu1 %2177, %v1293_v4  }
 0x4d4   : > { %v1297_v12 = vpop.f32.mrf.mxu1 }
 0x4d6   : > { %v1299_v2 = vpop.f32.mrf.mxu1 }
 0x4d7   : > { %1410 = vperm.xlu0 %2176, %v1299_v2  }
 0x4d8   : > { %v1301_v37 = vpop.f32.mrf.mxu1 }
 0x4d9   : > { %v1670_v40 = vpack.c.bf16 %v1301_v37, %v1297_v12 }
 0x4da   : > { %v1303_v9 = vpop.f32.mrf.mxu1 }
 0x4db   : > { %1415 = vperm.xlu1 %2177, %v1303_v9  }
 0x4dc   : > { %v1307_v14 = vpop.f32.mrf.mxu1 }
 0x4de   : > { %v1309_v5 = vpop.f32.mrf.mxu1 }
 0x4df   : > { %1420 = vperm.xlu0 %2176, %v1309_v5  }
 0x4e0   : > { %v1311_v19 = vpop.f32.mrf.mxu1 }
 0x4e1   : > { %v1671_v58 = vpack.c.bf16 %v1311_v19, %v1307_v14 }
 0x4e2   : > { %v1313_v29 = vpop.f32.mrf.mxu1 }
 0x4e3   : > { %2074 = vmatprep.subr.bf16.mxu0 %v1671_v58  ;;  %1425 = vperm.xlu1 %2177, %v1313_v29  }
 0x4e4   : > { %2075 = vmatpush3.bf16.msra.mxu0 %v1671_v58 }
 0x4e5   : > { %2076 = vmatprep.subr.bf16.mxu0 %v1670_v40 }
 0x4e8   : > { %2077 = vmatpush3.bf16.msra.mxu0 %v1670_v40 }
 0x4e9   : > { %2078 = vmatprep.subr.bf16.mxu0 %v1669_v15 }
 0x4ec   : > { %2079 = vmatpush3.bf16.msra.mxu0 %v1669_v15 }
 0x4ed   : > { %2080 = vmatprep.subr.bf16.mxu0 %v1668_v16 }
 0x4f0   : > { %2081 = vmatpush3.bf16.msra.mxu0 %v1668_v16 }
 0x4f1   : > { %2082 = vmatprep.subr.bf16.mxu0 %v1667_v33 }
 0x4f4   : > { %2083 = vmatpush3.bf16.msra.mxu0 %v1667_v33 }
 0x4f5   : > { %2084 = vmatprep.subr.bf16.mxu0 %v1666_v21 }
 0x4f8   : > { %2085 = vmatpush3.bf16.msra.mxu0 %v1666_v21 }
 0x4f9   : > { %2086 = vmatprep.subr.bf16.mxu0 %v1665_v42 }
 0x4fc   : > { %2087 = vmatpush3.bf16.msra.mxu0 %v1665_v42 }
 0x4fd   : > { %1316 = vxpose.xlu0.b32.start [1/16] (narrow) %v3021_v47, 8  ;;  %2088 = vmatprep.subr.bf16.mxu0 %v3024_v38 }
 0x500   : > { %2089 = vmatpush3.bf16.msra.mxu0 %v3024_v38 }
 0x501   : > { %1317 = vxpose.xlu0.b32.cont [2/16] (narrow) %v3026_v39, 8 }
 0x505   : > { %1318 = vxpose.xlu0.b32.cont [3/16] (narrow) %v3029_v41, 8 }
 0x509   : > { %1319 = vxpose.xlu0.b32.cont [4/16] (narrow) %v1253_v46, 8 }
 0x50d   : > { %1320 = vxpose.xlu0.b32.cont [5/16] (narrow) %v1259_v49, 8 }
 0x511   : > { %1321 = vxpose.xlu0.b32.cont [6/16] (narrow) %v1263_v63, 8 }
 0x515   : > { %1322 = vxpose.xlu0.b32.cont [7/16] (narrow) %v1269_v6, 8 }
 0x519   : > { %1323 = vxpose.xlu0.b32.cont [8/16] (narrow) %v1273_v60, 8 }
 0x51d   : > { %1324 = vxpose.xlu0.b32.cont [9/16] (narrow) %v1279_v13, 8 }
 0x521   : > { %1325 = vxpose.xlu0.b32.cont [10/16] (narrow) %v1283_v62, 8 }
 0x522   : > { %v1351_v45 = vpop.permute.xlu1 %1350 }
 0x525   : > { %1326 = vxpose.xlu0.b32.cont [11/16] (narrow) %v1289_v23, 8 }
 0x526   : > { %v1356_v51 = vpop.permute.xlu0 %1355 }
 0x529   : > { %1327 = vxpose.xlu0.b32.cont [12/16] (narrow) %v1293_v4, 8 }
 0x52a   : > { %v1361_v25 = vpop.permute.xlu1 %1360 }
 0x52d   : > { %1328 = vxpose.xlu0.b32.cont [13/16] (narrow) %v1299_v2, 8 }
 0x52e   : > { %v1366_v28 = vpop.permute.xlu1 %1365 }
 0x531   : > { %1329 = vxpose.xlu0.b32.cont [14/16] (narrow) %v1303_v9, 8 }
 0x532   : > { %v1371_v27 = vpop.permute.xlu0 %1370 }
 0x535   : > { %1330 = vxpose.xlu0.b32.cont [15/16] (narrow) %v1309_v5, 8 }
 0x536   : > { %v1376_v47 = vpop.permute.xlu1 %1375 }
 0x539   : > { %1331 = vxpose.xlu0.b32.end [16/16] (narrow) %v1313_v29, 8 }
 0x53a   : > { %v1381_v30 = vpop.permute.xlu0 %1380 }
 0x53e   : > { %v1386_v38 = vpop.permute.xlu1 %1385 }
 0x542   : > { %v1391_v48 = vpop.permute.xlu0 %1390 }
 0x546   : > { %v1396_v7 = vpop.permute.xlu1 %1395 }
 0x54a   : > { %v3037_v39 = vpop.permute.xlu0 %1400 }
 0x54e   : > { %v3041_v0 = vpop.permute.xlu1 %1405 }
 0x552   : > { %v3039_v41 = vpop.permute.xlu0 %1410 }
 0x556   : > { %v3045_v46 = vpop.permute.xlu1 %1415 }
 0x55a   : > { %v3043_v42 = vpop.permute.xlu0 %1420 }
 0x55e   : > { %v1426_v50 = vpop.permute.xlu1 %1425 }
 0x579   : > { %v1332_v54 = vpop.trf.xlu0 }
 0x57a   : > { %v3049_v49 = vrot.slane %v1332_v54, %v721_v31 }
 0x57c   : > { %v1432_v63 = vadd.f32 %v3049_v49, %v1351_v45  ;;  %v1447_v57 = vadd.f32 %v3049_v49, %v1426_v50  ;;  %v1433_v6 = vadd.f32 %v3049_v49, %v1356_v51  ;;  %v1434_v56 = vadd.f32 %v3049_v49, %v1361_v25 }
 0x57d   : > { %v1435_v52 = vadd.f32 %v3049_v49, %v1366_v28  ;;  %v1436_v32 = vadd.f32 %v3049_v49, %v1371_v27  ;;  %v1437_v14 = vadd.f32 %v3049_v49, %v1376_v47  ;;  %v1438_v58 = vadd.f32 %v3049_v49, %v1381_v30 }
 0x57e   : > { %vm1448_vm14 = vcmp.gt.f32.partialorder %v1432_v63, 0.0  ;;  %v1464_v60 = vmul.f32 0.2, %v1432_v63  ;;  %vm1463_vm2 = vcmp.gt.f32.partialorder %v1447_v57, 0.0  ;;  %v1479_v61 = vmul.f32 0.2, %v1447_v57 }
 0x57f   : > { %vm1449_vm4 = vcmp.gt.f32.partialorder %v1433_v6, 0.0  ;;  %v1465_v13 = vmul.f32 0.2, %v1433_v6  ;;  %v1466_v23 = vmul.f32 0.2, %v1434_v56  ;;  %vm1450_vm12 = vcmp.gt.f32.partialorder %v1434_v56, 0.0 }
 0x580   : > { %v1480_v8 = vsel %vm1448_vm14, %v1432_v63, %v1464_v60  ;;  %v1495_v62 = vsel %vm1463_vm2, %v1447_v57, %v1479_v61  ;;  %v1467_v12 = vmul.f32 0.2, %v1435_v52  ;;  %v1468_v9 = vmul.f32 0.2, %v1436_v32 }
 0x581   : > { %v3057_v24 = vsel %vm787_vm1, %v1480_v8, -1e+30  ;;  %v3061_v31 = vsel %vm802_vm8, %v1495_v62, -1e+30  ;;  %v1481_v18 = vsel %vm1449_vm4, %v1433_v6, %v1465_v13  ;;  %v1482_v35 = vsel %vm1450_vm12, %v1434_v56, %v1466_v23 }
 0x582   : > { %1512 = vmax.xlane.f32.xlu1 %v3057_v24  ;;  %1542 = vmax.xlane.f32.xlu0 %v3061_v31  ;;  %v3068_v4 = vsel %vm788_vm5, %v1481_v18, -1e+30  ;;  %vm1451_vm1 = vcmp.gt.f32.partialorder %v1435_v52, 0.0  ;;  %v3074_v2 = vsel %vm789_vm7, %v1482_v35, -1e+30  ;;  %vm1452_vm4 = vcmp.gt.f32.partialorder %v1436_v32, 0.0 }
 0x583   : > { %v1483_v37 = vsel %vm1451_vm1, %v1435_v52, %v1467_v12  ;;  %v1484_v5 = vsel %vm1452_vm4, %v1436_v32, %v1468_v9  ;;  %v1469_v19 = vmul.f32 0.2, %v1437_v14  ;;  %vm1453_vm5 = vcmp.gt.f32.partialorder %v1437_v14, 0.0 }
 0x584   : > { %v3080_v43 = vsel %vm790_vm9, %v1483_v37, -1e+30  ;;  %v3086_v53 = vsel %vm791_vm11, %v1484_v5, -1e+30  ;;  %v1470_v40 = vmul.f32 0.2, %v1438_v58  ;;  %v1439_v15 = vadd.f32 %v3049_v49, %v1386_v38 }
 0x585   : > { %v1485_v29 = vsel %vm1453_vm5, %v1437_v14, %v1469_v19  ;;  %vm1454_vm7 = vcmp.gt.f32.partialorder %v1438_v58, 0.0  ;;  %v1440_v21 = vadd.f32 %v3049_v49, %v1391_v48  ;;  %v1441_v25 = vadd.f32 %v3049_v49, %v1396_v7 }
 0x586   : > { %1514 = vmax.xlane.f32.xlu1 %v3068_v4  ;;  %v3092_v59 = vsel %vm792_vm13, %v1485_v29, -1e+30  ;;  %v1486_v16 = vsel %vm1454_vm7, %v1438_v58, %v1470_v40  ;;  %v1471_v33 = vmul.f32 0.2, %v1439_v15  ;;  %vm1455_vm9 = vcmp.gt.f32.partialorder %v1439_v15, 0.0 }
 0x587   : > { %v3098_v3 = vsel %vm793_vm15, %v1486_v16, -1e+30  ;;  %v1472_v51 = vmul.f32 0.2, %v1440_v21  ;;  %vm1456_vm11 = vcmp.gt.f32.partialorder %v1440_v21, 0.0  ;;  %v1442_v17 = vadd.f32 %v3049_v49, %v3037_v39 }
 0x588   : > { %v1487_v45 = vsel %vm1455_vm9, %v1439_v15, %v1471_v33  ;;  %v1473_v28 = vmul.f32 0.2, %v1441_v25  ;;  %vm1457_vm13 = vcmp.gt.f32.partialorder %v1441_v25, 0.0  ;;  %v1443_v34 = vadd.f32 %v3049_v49, %v3041_v0 }
 0x589   : > { %v3104_v10 = vsel %vm794_vm0, %v1487_v45, -1e+30  ;;  %v1488_v27 = vsel %vm1456_vm11, %v1440_v21, %v1472_v51  ;;  %v1474_v48 = vmul.f32 0.2, %v1442_v17  ;;  %vm1458_vm0 = vcmp.gt.f32.partialorder %v1442_v17, 0.0 }
 0x58a   : > { %1516 = vmax.xlane.f32.xlu1 %v3074_v2  ;;  %v3111_v30 = vsel %vm795_vm3, %v1488_v27, -1e+30  ;;  %v1489_v47 = vsel %vm1457_vm13, %v1441_v25, %v1473_v28  ;;  %v1475_v7 = vmul.f32 0.2, %v1443_v34  ;;  %v1444_v26 = vadd.f32 %v3049_v49, %v3039_v41 }
 0x58b   : > { %v3118_v38 = vsel %vm796_vm6, %v1489_v47, -1e+30  ;;  %v1490_v39 = vsel %vm1458_vm0, %v1442_v17, %v1474_v48  ;;  %vm1459_vm15 = vcmp.gt.f32.partialorder %v1443_v34, 0.0  ;;  %v1445_v36 = vadd.f32 %v3049_v49, %v3045_v46 }
 0x58c   : > { %v3125_v54 = vsel %vm797_vm10, %v1490_v39, -1e+30  ;;  %v1491_v0 = vsel %vm1459_vm15, %v1443_v34, %v1475_v7  ;;  %v1476_v50 = vmul.f32 0.2, %v1444_v26  ;;  %vm1460_vm3 = vcmp.gt.f32.partialorder %v1444_v26, 0.0 }
 0x58d   : > { %vm3295_vm6 = vcmp.gt.f32.partialorder %v2813_v55, 0.0  ;;  %v1477_v57 = vmul.f32 0.2, %v1445_v36  ;;  %v1446_v44 = vadd.f32 %v3049_v49, %v3043_v42  ;;  %vm1461_vm10 = vcmp.gt.f32.partialorder %v1445_v36, 0.0 }
 0x58e   : > { %1518 = vmax.xlane.f32.xlu1 %v3080_v43  ;;  %v3132_v63 = vsel %vm3295_vm6, %v1491_v0, -1e+30  ;;  %v1492_v41 = vsel %vm1460_vm3, %v1444_v26, %v1476_v50  ;;  %vm3296_vm12 = vcmp.gt.f32.partialorder %v2822_v1, 0.0  ;;  %vm3297_vm14 = vcmp.gt.f32.partialorder %v2831_v11, 0.0 }
 0x58f   : > { %v3139_v6 = vsel %vm3296_vm12, %v1492_v41, -1e+30  ;;  %v1493_v46 = vsel %vm1461_vm10, %v1445_v36, %v1477_v57  ;;  %v1478_v56 = vmul.f32 0.2, %v1446_v44  ;;  %vm1462_vm8 = vcmp.gt.f32.partialorder %v1446_v44, 0.0 }
 0x590   : > { %v3144_v55 = vsel %vm3297_vm14, %v1493_v46, -1e+30  ;;  %vm3298_vm2 = vcmp.gt.f32.partialorder %v2841_v20, 0.0  ;;  %vm2456_vm1 = vmmov 0  }
 0x591   : > { %v1494_v60 = vsel %vm1462_vm8, %v1446_v44, %v1478_v56 }
 0x592   : > { %1520 = vmax.xlane.f32.xlu1 %v3086_v53  ;;  %v3149_v42 = vsel %vm3298_vm2, %v1494_v60, -1e+30 }
 0x596   : > { %1522 = vmax.xlane.f32.xlu1 %v3092_v59 }
 0x59a   : > { %1524 = vmax.xlane.f32.xlu1 %v3098_v3 }
 0x59e   : > { %1526 = vmax.xlane.f32.xlu1 %v3104_v10 }
 0x5a2   : > { %1528 = vmax.xlane.f32.xlu1 %v3111_v30 }
 0x5a6   : > { %1530 = vmax.xlane.f32.xlu1 %v3118_v38 }
 0x5aa   : > { %1532 = vmax.xlane.f32.xlu1 %v3125_v54 }
 0x5ae   : > { %1534 = vmax.xlane.f32.xlu1 %v3132_v63 }
 0x5b2   : > { %1536 = vmax.xlane.f32.xlu1 %v3139_v6 }
 0x5b6   : > { %1538 = vmax.xlane.f32.xlu1 %v3144_v55 }
 0x5ba   : > { %1540 = vmax.xlane.f32.xlu1 %v3149_v42 }
 0x60b   : > { %v1513_v1 = vpop.xlane.xlu1 %1512  ;;  %v1543_v39 = vpop.xlane.xlu0 %1542 }
 0x60c   : > { %v1544_v49 = vsub.f32 %v3057_v24, %v1513_v1  ;;  %v1559_v0 = vsub.f32 %v3061_v31, %v1543_v39 }
 0x60e   : > { %v1560_v61 = vmul.f32 1.442695, %v1544_v49  ;;  %v1590_v57 = vmul.f32 1.442695, %v1559_v0 }
 0x60f   : > { %v1515_v13 = vpop.xlane.xlu1 %1514 }
 0x610   : > { %v1545_v8 = vsub.f32 %v3068_v4, %v1515_v13  ;;  %2290 = vpow2.f32 %v1560_v61 }
 0x612   : > { %v1562_v11 = vmul.f32 1.442695, %v1545_v8 }
 0x613   : > { %v1517_v62 = vpop.xlane.xlu1 %1516 }
 0x614   : > { %2292 = vpow2.f32 %v1562_v11  ;;  %v1546_v18 = vsub.f32 %v3074_v2, %v1517_v62 }
 0x616   : > { %v1564_v23 = vmul.f32 1.442695, %v1546_v18 }
 0x617   : > { %v1519_v52 = vpop.xlane.xlu1 %1518 }
 0x618   : > { %2294 = vpow2.f32 %v1564_v23  ;;  %v1547_v20 = vsub.f32 %v3080_v43, %v1519_v52 }
 0x61a   : > { %v1566_v35 = vmul.f32 1.442695, %v1547_v20 }
 0x61b   : > { %v1521_v12 = vpop.xlane.xlu1 %1520 }
 0x61c   : > { %2296 = vpow2.f32 %v1566_v35  ;;  %v1548_v24 = vsub.f32 %v3086_v53, %v1521_v12 }
 0x61d   : > { %v3157_v32 = vpop.eup %2290 }
 0x61e   : > { %v1568_v37 = vmul.f32 1.442695, %v1548_v24  ;;  %1592 = vadd.xlane.f32.xlu1 %v3157_v32 }
 0x61f   : > { %v1523_v4 = vpop.xlane.xlu1 %1522 }
 0x620   : > { %2298 = vpow2.f32 %v1568_v37  ;;  %v1549_v9 = vsub.f32 %v3092_v59, %v1523_v4 }
 0x621   : > { %v3161_v2 = vpop.eup %2292 }
 0x622   : > { %v1570_v14 = vmul.f32 1.442695, %v1549_v9  ;;  %1594 = vadd.xlane.f32.xlu1 %v3161_v2 }
 0x623   : > { %v1525_v43 = vpop.xlane.xlu1 %1524 }
 0x624   : > { %2300 = vpow2.f32 %v1570_v14  ;;  %v1550_v5 = vsub.f32 %v3098_v3, %v1525_v43 }
 0x625   : > { %v3165_v19 = vpop.eup %2294 }
 0x626   : > { %v1572_v58 = vmul.f32 1.442695, %v1550_v5  ;;  %1596 = vadd.xlane.f32.xlu1 %v3165_v19 }
 0x627   : > { %v1527_v53 = vpop.xlane.xlu1 %1526 }
 0x628   : > { %2302 = vpow2.f32 %v1572_v58  ;;  %v1551_v29 = vsub.f32 %v3104_v10, %v1527_v53 }
 0x629   : > { %v3169_v40 = vpop.eup %2296 }
 0x62a   : > { %v1574_v15 = vmul.f32 1.442695, %v1551_v29  ;;  %1598 = vadd.xlane.f32.xlu1 %v3169_v40 }
 0x62b   : > { %v1529_v59 = vpop.xlane.xlu1 %1528 }
 0x62c   : > { %2304 = vpow2.f32 %v1574_v15  ;;  %v1552_v16 = vsub.f32 %v3111_v30, %v1529_v59 }
 0x62d   : > { %v3173_v33 = vpop.eup %2298 }
 0x62e   : > { %v1576_v21 = vmul.f32 1.442695, %v1552_v16  ;;  %1600 = vadd.xlane.f32.xlu1 %v3173_v33 }
 0x62f   : > { %v1531_v3 = vpop.xlane.xlu1 %1530 }
 0x630   : > { %2306 = vpow2.f32 %v1576_v21  ;;  %v1553_v45 = vsub.f32 %v3118_v38, %v1531_v3 }
 0x631   : > { %v3177_v51 = vpop.eup %2300 }
 0x632   : > { %v1578_v25 = vmul.f32 1.442695, %v1553_v45  ;;  %1602 = vadd.xlane.f32.xlu1 %v3177_v51 }
 0x633   : > { %v1533_v10 = vpop.xlane.xlu1 %1532 }
 0x634   : > { %2308 = vpow2.f32 %v1578_v25  ;;  %v1554_v27 = vsub.f32 %v3125_v54, %v1533_v10 }
 0x635   : > { %v3181_v28 = vpop.eup %2302 }
 0x636   : > { %v1580_v17 = vmul.f32 1.442695, %v1554_v27  ;;  %1604 = vadd.xlane.f32.xlu1 %v3181_v28 }
 0x637   : > { %v1535_v30 = vpop.xlane.xlu1 %1534 }
 0x638   : > { %2310 = vpow2.f32 %v1580_v17  ;;  %v1555_v47 = vsub.f32 %v3132_v63, %v1535_v30 }
 0x639   : > { %v3185_v48 = vpop.eup %2304 }
 0x63a   : > { %v1582_v34 = vmul.f32 1.442695, %v1555_v47  ;;  %1606 = vadd.xlane.f32.xlu1 %v3185_v48 }
 0x63b   : > { %v1537_v38 = vpop.xlane.xlu1 %1536 }
 0x63c   : > { %2312 = vpow2.f32 %v1582_v34  ;;  %v1556_v7 = vsub.f32 %v3139_v6, %v1537_v38 }
 0x63d   : > { %v3189_v26 = vpop.eup %2306 }
 0x63e   : > { %v1584_v54 = vmul.f32 1.442695, %v1556_v7  ;;  %1608 = vadd.xlane.f32.xlu1 %v3189_v26 }
 0x63f   : > { %v1539_v50 = vpop.xlane.xlu1 %1538 }
 0x640   : > { %2314 = vpow2.f32 %v1584_v54  ;;  %v1557_v36 = vsub.f32 %v3144_v55, %v1539_v50 }
 0x641   : > { %v3194_v63 = vpop.eup %2308 }
 0x642   : > { %v1586_v41 = vmul.f32 1.442695, %v1557_v36  ;;  %1610 = vadd.xlane.f32.xlu1 %v3194_v63 }
 0x643   : > { %v1541_v44 = vpop.xlane.xlu1 %1540 }
 0x644   : > { %2316 = vpow2.f32 %v1586_v41  ;;  %v1558_v6 = vsub.f32 %v3149_v42, %v1541_v44 }
 0x645   : > { %v3198_v46 = vpop.eup %2310  ;;  %2318 = vpow2.f32 %v1590_v57 }
 0x646   : > { %v1588_v56 = vmul.f32 1.442695, %v1558_v6  ;;  %1612 = vadd.xlane.f32.xlu1 %v3198_v46 }
 0x648   : > { %2320 = vpow2.f32 %v1588_v56 }
 0x649   : > { %v3201_v31 = vpop.eup %2312 }
 0x64a   : > { %1614 = vadd.xlane.f32.xlu0 %v3201_v31 }
 0x64d   : > { %v3204_v55 = vpop.eup %2314 }
 0x64e   : > { %1616 = vadd.xlane.f32.xlu1 %v3204_v55 }
 0x651   : > { %v3207_v60 = vpop.eup %2316 }
 0x652   : > { %1618 = vadd.xlane.f32.xlu0 %v3207_v60  ;;  %v3210_v42 = vpop.eup %2318 }
 0x655   : > { %v3212_v1 = vpop.eup %2320 }
 0x656   : > { %1622 = vadd.xlane.f32.xlu0 %v3210_v42  ;;  %1620 = vadd.xlane.f32.xlu1 %v3212_v1 }
 0x6a7   : > { %v1593_v49 = vpop.xlane.xlu1 %1592 }
 0x6a8   : > { %2322 = vrcp.f32 %v1593_v49 }
 0x6ab   : > { %v1595_v61 = vpop.xlane.xlu1 %1594 }
 0x6ac   : > { %2324 = vrcp.f32 %v1595_v61 }
 0x6af   : > { %v1597_v13 = vpop.xlane.xlu1 %1596 }
 0x6b0   : > { %2326 = vrcp.f32 %v1597_v13 }
 0x6b3   : > { %v1599_v8 = vpop.xlane.xlu1 %1598 }
 0x6b4   : > { %2328 = vrcp.f32 %v1599_v8 }
 0x6b5   : > { %v2323_v11 = vpop.eup %2322 }
 0x6b6   : > { %v1640_v23 = vmul.f32 %v2323_v11, %v3157_v32 }
 0x6b7   : > { %v1601_v62 = vpop.xlane.xlu1 %1600 }
 0x6b8   : > { %2330 = vrcp.f32 %v1601_v62 }
 0x6b9   : > { %v2325_v18 = vpop.eup %2324 }
 0x6ba   : > { %v1641_v52 = vmul.f32 %v2325_v18, %v3161_v2 }
 0x6bb   : > { %v1603_v20 = vpop.xlane.xlu1 %1602 }
 0x6bc   : > { %2332 = vrcp.f32 %v1603_v20  ;;  %v1656_v35 = vpack.c.bf16 %v1641_v52, %v1640_v23  ;;  %v1995_v52 = vld [vmem:[%s3279_s6] ss:$0 sm:$0xff] }
 0x6bd   : > { %v2327_v12 = vpop.eup %2326 }
 0x6be   : > { %2090 = vmatprep.mubr.bf16.mxu0 %v1656_v35  ;;  %v1642_v4 = vmul.f32 %v2327_v12, %v3165_v19 }
 0x6bf   : > { %v1605_v24 = vpop.xlane.xlu1 %1604 }
 0x6c0   : > { %2334 = vrcp.f32 %v1605_v24 }
 0x6c1   : > { %v2329_v37 = vpop.eup %2328 }
 0x6c2   : > { %v1643_v9 = vmul.f32 %v2329_v37, %v3169_v40 }
 0x6c3   : > { %v1607_v14 = vpop.xlane.xlu1 %1606 }
 0x6c4   : > { %2336 = vrcp.f32 %v1607_v14  ;;  %v1657_v43 = vpack.c.bf16 %v1643_v9, %v1642_v4 }
 0x6c5   : > { %v2331_v5 = vpop.eup %2330 }
 0x6c6   : > { %2091 = vmatmul.mubr.bf16.vlgmr.msra.gmra.mxu0 %v1657_v43  ;;  %v1644_v2 = vmul.f32 %v2331_v5, %v3173_v33 }
 0x6c7   : > { %v1609_v32 = vpop.xlane.xlu1 %1608 }
 0x6c8   : > { %2338 = vrcp.f32 %v1609_v32 }
 0x6c9   : > { %v2333_v58 = vpop.eup %2332 }
 0x6ca   : > { %v1645_v53 = vmul.f32 %v2333_v58, %v3177_v51 }
 0x6cb   : > { %v1611_v29 = vpop.xlane.xlu1 %1610 }
 0x6cc   : > { %2340 = vrcp.f32 %v1611_v29  ;;  %v1658_v15 = vpack.c.bf16 %v1645_v53, %v1644_v2 }
 0x6cd   : > { %v2335_v59 = vpop.eup %2334 }
 0x6ce   : > { %2094 = vmatprep.mubr.bf16.mxu0 %v1658_v15  ;;  %v1646_v21 = vmul.f32 %v2335_v59, %v3181_v28 }
 0x6cf   : > { %v1613_v19 = vpop.xlane.xlu1 %1612 }
 0x6d0   : > { %2342 = vrcp.f32 %v1613_v19 }
 0x6d1   : > { %v2337_v16 = vpop.eup %2336 }
 0x6d2   : > { %v1647_v3 = vmul.f32 %v2337_v16, %v3185_v48 }
 0x6d3   : > { %v1615_v40 = vpop.xlane.xlu0 %1614 }
 0x6d4   : > { %2344 = vrcp.f32 %v1615_v40  ;;  %v1659_v45 = vpack.c.bf16 %v1647_v3, %v1646_v21 }
 0x6d5   : > { %v2339_v33 = vpop.eup %2338 }
 0x6d6   : > { %2095 = vmatmul.mubr.bf16.gmra.mxu0 %v1659_v45  ;;  %v1648_v27 = vmul.f32 %v2339_v33, %v3189_v26 }
 0x6d7   : > { %v1617_v25 = vpop.xlane.xlu1 %1616 }
 0x6d8   : > { %2346 = vrcp.f32 %v1617_v25 }
 0x6d9   : > { %v2341_v10 = vpop.eup %2340 }
 0x6da   : > { %v1649_v17 = vmul.f32 %v2341_v10, %v3194_v63 }
 0x6db   : > { %v1619_v51 = vpop.xlane.xlu0 %1618 }
 0x6dc   : > { %2348 = vrcp.f32 %v1619_v51  ;;  %v1660_v30 = vpack.c.bf16 %v1649_v17, %v1648_v27  ;;  %v1775_v51 = vld [vmem:[%s2600_s17] sm:$0xf]  ;;  %v1825_v27 = vand.u32 127, %v719_v22  ;;  %s1957_s17 = sshll.u32 %s2596_s8, 3 }
 0x6dd   : > { %v2343_v47 = vpop.eup %2342  ;;  %s324_s21 = scalar_lea.vmem [#allocation5], %s1957_s17 }
 0x6de   : > { %2098 = vmatprep.mubr.bf16.mxu0 %v1660_v30  ;;  %v1650_v38 = vmul.f32 %v2343_v47, %v3198_v46  ;;  %v2455_v46 = vmov 0.0   ;;  %vm1826_vm4 = vcmp.lt.s32.totalorder %v1825_v27, 4  ;;  %s1856_s9 = sshll.u32 %s324_s21, 4  ;;  %s1857_s9 = int_to_ptr.vmem [resolvable:$true] %s1856_s9 }
 0x6df   : > { %v1623_v34 = vpop.xlane.xlu0 %1622  ;;  %v1621_v28 = vpop.xlane.xlu1 %1620  ;;  %2106 = vmatprep.subr.bf16.mxu0 %v2455_v46  ;;  %s2386_s22 = scalar_lea.vmem %s1857_s9, 128  ;;  %p2393_p8 = scmp.lt.s32.totalorder %s1857_s9, %s2391_s18 }
 0x6e0   : > { %2350 = vrcp.f32 %v1623_v34  ;;  %p2387_p13 = scmp.ne.s32.totalorder %s1857_s9, %s2386_s22  ;;  %p2394_p10 = scmp.lt.s32.totalorder %s2392_s28, %s2386_s22 }
 0x6e1   : > { %v2345_v48 = vpop.eup %2344  ;;  %2352 = vrcp.f32 %v1621_v28 }
 0x6e2   : > { %v1651_v39 = vmul.f32 %v2345_v48, %v3201_v31  ;;  %p2388_p3 = pnand %p2387_p13, %p3299_p1  ;;  %p2395_p2 = por %p2394_p10, %p2393_p8 }
 0x6e4   : > { %v1661_v7 = vpack.c.bf16 %v1651_v39, %v1650_v38  ;;  %p2389_p5 = pneg %p2388_p3 }
 0x6e5   : > { %v2347_v54 = vpop.eup %2346 }
 0x6e6   : > { %2099 = vmatmul.mubr.bf16.gmra.mxu0 %v1661_v7  ;;  %v1652_v26 = vmul.f32 %v2347_v54, %v3204_v55  ;;  %p2396_p4 = pnand %p2395_p2, %p2389_p5 }
 0x6e9   : > { %v2349_v0 = vpop.eup %2348 }
 0x6ea   : > { %v1653_v50 = vmul.f32 %v2349_v0, %v3207_v60 }
 0x6ec   : > { %v1662_v36 = vpack.c.bf16 %v1653_v50, %v1652_v26 }
 0x6ed   : > { %v2351_v63 = vpop.eup %2350 }
 0x6ee   : > { %v2353_v41 = vpop.eup %2352  ;;  %2102 = vmatprep.mubr.bf16.mxu0 %v1662_v36  ;;  %v1655_v57 = vmul.f32 %v2351_v63, %v3210_v42 }
 0x6ef   : > { %v1654_v44 = vmul.f32 %v2353_v41, %v3212_v1 }
 0x6f1   : > { %v1663_v6 = vpack.c.bf16 %v1655_v57, %v1654_v44 }
 0x6f3   : > { %2103 = vmatmul.mubr.bf16.gmra.mxu0 %v1663_v6 }
 0x6f4   : > { %2122 = vmatprep.mubr.msk.bf16.mxu0 %vm2456_vm1, %v2455_v46 }
 0x786   : > { %v2092_v56 = vpop.f32.mrf.mxu0 }
 0x787   : > { %v1721_v3 = vadd.f32 %v2092_v56, %v1995_v52 }
 0x788   : > { %v1712_v31 = vpop.f32.mrf.mxu0 }
 0x789   : > { %v1713_v33 = vadd.f32 %v1995_v52, %v1712_v31 }
 0x78a   : > { %v2093_v49 = vpop.f32.mrf.mxu0 }
 0x78b   : > { %v1724_v40 = vadd.f32 %v2093_v49, %v1995_v52 }
 0x78c   : > { %v1715_v55 = vpop.f32.mrf.mxu0 }
 0x78d   : > { %v1777_v45 = vpack.c.bf16 %v1724_v40, %v1721_v3  ;;  %v1716_v25 = vadd.f32 %v1995_v52, %v1715_v55 }
 0x78f   : > { %v1776_v10 = vpack.c.bf16 %v1716_v25, %v1713_v33 }
 0x796   : > { %v2096_v61 = vpop.f32.mrf.mxu0 }
 0x797   : > { %v1737_v15 = vadd.f32 %v2096_v61, %v1995_v52 }
 0x798   : > { %v1728_v60 = vpop.f32.mrf.mxu0 }
 0x799   : > { %v1729_v16 = vadd.f32 %v1995_v52, %v1728_v60 }
 0x79a   : > { %v2097_v13 = vpop.f32.mrf.mxu0 }
 0x79b   : > { %v1740_v53 = vadd.f32 %v2097_v13, %v1995_v52 }
 0x79c   : > { %v1731_v8 = vpop.f32.mrf.mxu0 }
 0x79d   : > { %v1779_v59 = vpack.c.bf16 %v1740_v53, %v1737_v15  ;;  %v1732_v19 = vadd.f32 %v1995_v52, %v1731_v8 }
 0x79f   : > { %v1778_v21 = vpack.c.bf16 %v1732_v19, %v1729_v16 }
 0x7a6   : > { %v2100_v11 = vpop.f32.mrf.mxu0 }
 0x7a7   : > { %v1753_v5 = vadd.f32 %v2100_v11, %v1995_v52 }
 0x7a8   : > { %v1744_v62 = vpop.f32.mrf.mxu0 }
 0x7a9   : > { %v1745_v2 = vadd.f32 %v1995_v52, %v1744_v62 }
 0x7aa   : > { %v2101_v18 = vpop.f32.mrf.mxu0 }
 0x7ab   : > { %v1756_v14 = vadd.f32 %v2101_v18, %v1995_v52 }
 0x7ac   : > { %v1747_v42 = vpop.f32.mrf.mxu0 }
 0x7ad   : > { %v1781_v32 = vpack.c.bf16 %v1756_v14, %v1753_v5  ;;  %v1748_v58 = vadd.f32 %v1995_v52, %v1747_v42 }
 0x7af   : > { %v1780_v29 = vpack.c.bf16 %v1748_v58, %v1745_v2 }
 0x7b3   : > { %v2104_v23 = vpop.f32.mrf.mxu0 }
 0x7b4   : > { %v1769_v35 = vadd.f32 %v2104_v23, %v1995_v52 }
 0x7b5   : > { %v1760_v1 = vpop.f32.mrf.mxu0 }
 0x7b6   : > { %v1761_v9 = vadd.f32 %v1995_v52, %v1760_v1 }
 0x7b7   : > { %v2105_v20 = vpop.f32.mrf.mxu0 }
 0x7b8   : > { %v1772_v12 = vadd.f32 %v2105_v20, %v1995_v52 }
 0x7b9   : > { %v1763_v24 = vpop.f32.mrf.mxu0 }
 0x7ba   : > { %v1783_v37 = vpack.c.bf16 %v1772_v12, %v1769_v35  ;;  %v1764_v4 = vadd.f32 %v1995_v52, %v1763_v24 }
 0x7bc   : > { %2107 = vmatpush3.bf16.msra.mxu0 %v1783_v37  ;;  %v1782_v43 = vpack.c.bf16 %v1764_v4, %v1761_v9 }
 0x7bd   : > { %2108 = vmatprep.subr.bf16.mxu0 %v2455_v46 }
 0x7c0   : > { %2109 = vmatpush3.bf16.msra.mxu0 %v1782_v43 }
 0x7c1   : > { %2110 = vmatprep.subr.bf16.mxu0 %v2455_v46 }
 0x7c4   : > { %2111 = vmatpush3.bf16.msra.mxu0 %v1781_v32 }
 0x7c5   : > { %2112 = vmatprep.subr.bf16.mxu0 %v2455_v46 }
 0x7c8   : > { %2113 = vmatpush3.bf16.msra.mxu0 %v1780_v29 }
 0x7c9   : > { %2114 = vmatprep.subr.bf16.mxu0 %v2455_v46 }
 0x7cc   : > { %2115 = vmatpush3.bf16.msra.mxu0 %v1779_v59 }
 0x7cd   : > { %2116 = vmatprep.subr.bf16.mxu0 %v2455_v46 }
 0x7d0   : > { %2117 = vmatpush3.bf16.msra.mxu0 %v1778_v21 }
 0x7d1   : > { %2118 = vmatprep.subr.bf16.mxu0 %v2455_v46 }
 0x7d4   : > { %2119 = vmatpush3.bf16.msra.mxu0 %v1777_v45 }
 0x7d5   : > { %2120 = vmatprep.subr.bf16.mxu0 %v2455_v46 }
 0x7d8   : > { %2121 = vmatpush3.bf16.msra.mxu0 %v1776_v10 }
 0x7db   : > { %2123 = vmatmul.mubr.bf16.vlgmr.msra.gmra.mxu0 %v1775_v51 }
 0x89b   : > { %v1818_v17 = vpop.f32.mrf.mxu0 }
 0x89c   : > { %v1829_v30 = vsel %vm1826_vm4, %v1818_v17, -1e+30 }
 0x89d   : > { %1830 = vmax.xlane.f32.xlu1 %v1829_v30  ;;  %v2124_v47 = vpop.f32.mrf.mxu0 }
 0x89f   : > { %v1821_v34 = vpop.f32.mrf.mxu0 }
 0x8a1   : > { %v2125_v28 = vpop.f32.mrf.mxu0 }
 0x926   : > { %v1831_v48 = vpop.xlane.xlu1 %1830 }
 0x927   : > { %v1832_v38 = vsub.f32 %v1829_v30, %v1831_v48 }
 0x929   : > { %v1833_v39 = vmul.f32 1.442695, %v1832_v38 }
 0x92b   : > { %2354 = vpow2.f32 %v1833_v39 }
 0x938   : > { %v2355_v7 = vpop.eup %2354 }
 0x939   : > { %1835 = vadd.xlane.f32.xlu0 %v2355_v7 }
 0x9c2   : > { %v1836_v54 = vpop.xlane.xlu0 %1835 }
 0x9c3   : > { %2356 = vlog2.f32 %v1836_v54 }
 0x9d0   : > { %v2357_v22 = vpop.eup %2356 }
 0x9d1   : > { %v1838_v0 = vmul.f32 0.6931472, %v2357_v22 }
 0x9d3   : > { %v1839_v26 = vadd.f32 %v1838_v0, %v1831_v48 }
 0x9d5   : > { %v1840_v50 = vsub.f32 %v1829_v30, %v1839_v26 }
 0x9d7   : > { %1841 = vst [vmem:[%s324_s21] sm:$0xff] %v1840_v50 }
 0x9d8   : > { %2399 = shalt.err (!%p2396_p4)
}
 0x9d9   : > { %s2400_s15 = scalar_lea.hbm %s1854_s23, 128  ;;  %s2404_s17 = scalar_lea.hbm %s3280_s7, 256 }
 0x9da   : > { %p2401_p9 = scmp.ne.s32.totalorder %s1854_s23, %s2400_s15  ;;  %p2405_p6 = scmp.lt.s32.totalorder %s1854_s23, %s3280_s7 }
 0x9db   : > { %p2406_p11 = scmp.lt.s32.totalorder %s2404_s17, %s2400_s15 }
 0x9dc   : > { %p2402_p7 = pnand %p2401_p9, %p3299_p1 }
 0x9dd   : > { %p2407_p12 = por %p2406_p11, %p2405_p6 }
 0x9de   : > { %p2403_p0 = pneg %p2402_p7 }
 0x9e0   : > { %p2408_p13 = pnand %p2407_p12, %p2403_p0 }
 0x9e2   : > { %2411 = shalt.err (!%p2408_p13)
}
 0x9e3   : > { %2128 = dma.vmem_to_hbm [thread:$0]  (%p3299_p1), %s1857_s9, 128, %s1854_s23, %s1843_s20  }
 0x9e4 PF: > { %s1868_s16 = sand.u32 1, %s2438_s24   ;;  %p3300_p3 = scmp.ne.s32.totalorder %s3290_s14, 0 }
 0x9e5   : > { %p3301_p5 = scmp.ge.s32.totalorder %s2450_s27, 2  ;;  %s1869_s11 = scalar_lea.sflag [#allocation4], %s1868_s16 }
 0x9e7   : > { %p2135_p8 = pnand %p3301_p5, %p3300_p3 }
 0x9e9   : > { %p2136_p10 = pneg %p2135_p8 }
 0x9eb   : > { %2433 = dma.done.wait (%p2136_p10), %s1869_s11, 128  }
 0x9ec   : > { %2435 = vsyncadd (%p2136_p10), %s1869_s11, 4294967168  ;;  %p20_p2 = scmp.ge.s32.totalorder %s2523_s30, 4   ;;  %s3302_s24 = smov %s2442_s25 }
 0x9ed   : > { %s3303_s25 = smov %s2446_s26  ;;  %s3304_s26 = smov %s2535_s10 }
 0x9ee   : > { %s3305_s27 = smov %s2523_s30  ;;  %22 = sbr.rel (!%p20_p2) target bundleno = 5 (0x5), region = 99 }
 0x9f3   :  { %1874 = vsyncpa [#allocation3], 1 }
 0x9f4   :  { %1876 = vsyncpa [#allocation3 + $0x1], 1 }
 0x9f5   :  { %1877 = vsyncpa [#allocation4], 1 }
 0x9f6   :  { %1879 = vsyncpa [#allocation4 + $0x1], 1 }

</bundles_post_ra>
